<compile_context>
chip_gen: v6e
topology: v6e:2x2x1
jax: 0.10.0
libtpu: 0.0.40
codegen_flags: <defaults>
</compile_context>

<pallas_src>
import jax
import jax.numpy as jnp
from jax.experimental import pallas as pl
from jax.experimental.pallas import tpu as pltpu


FEATURE_DIM = 64     # stands in for the 960-ch last stage of mobilenetv3_large
N_SHAPE = 300        # module default
N_SHAPE_PAD = 384    # head padded to 3*128 lanes -> unmasked final store

# channel plan of the synthetic backbone
C_STEM = 16
C1_EXP, C1_OUT = 32, 24
C2_EXP, C2_OUT = 48, 32

_WEIGHT_KEYS = (
    "stem_w", "stem_b",
    "b1_exp_w", "b1_exp_b", "b1_dw_w", "b1_dw_b", "b1_proj_w", "b1_proj_b",
    "b2_exp_w", "b2_exp_b", "b2_dw_w", "b2_dw_b", "b2_proj_w", "b2_proj_b",
    "final_w", "final_b", "head_w", "head_b",
)


def _tap_phase_shift(d):
    # pad-1 / stride-2 / 3x3 conv tap d (=0,1,2) -> (stride-phase, shift):
    #   d=0 -> phase 1, shift 1 (the shifted-in element is the conv zero pad)
    #   d=1 -> phase 0, shift 0
    #   d=2 -> phase 1, shift 0
    return (0 if d == 1 else 1), (1 if d == 0 else 0)


# -----------------------------------------------------------------------------
# Fused kernel: stem conv + block1 + block2 + final 1x1 conv + avg-pool + head.
# One batch-block (Bb images) per grid step; weights resident in VMEM.
# -----------------------------------------------------------------------------
def _encoder_kernel(
    cols_ref,                                              # (Bb, 4*H2*W2, 9*Cin)
    ws_ref, bs_ref,                                        # stem
    w1e_ref, b1e_ref, w1d_ref, b1d_ref, w1p_ref, b1p_ref,  # block1
    w2e_ref, b2e_ref, w2d_ref, b2d_ref, w2p_ref, b2p_ref,  # block2
    wf_ref, bf_ref, wh_ref, bh_ref,                        # final conv + head
    o_ref,                                                 # (Bb, 1, N_SHAPE_PAD)
    e00_sc, e01_sc, e10_sc, e11_sc,                        # (Bb, H2+1, W2+1, C1_EXP)
    pad_sc,                                                # (Bb, H2+2, W2+2, C2_EXP)
):
    bb = cols_ref.shape[0]
    k = cols_ref.shape[2]
    h2 = e00_sc.shape[1] - 1
    w2 = e00_sc.shape[2] - 1
    c1e = e00_sc.shape[3]
    c2e = pad_sc.shape[3]
    m_full = bb * 4 * h2 * w2    # stem-resolution rows (grouped by stride-phase)
    m_half = bb * h2 * w2        # rows after the stride-2 depthwise conv

    # ---- stem 3x3 s2 conv (+ReLU): ONE K=27 MXU dot over all Bb*Ho*Wo rows.
    # cols rows are ordered (b, p, q, a, c): the block-1 stride-2 phases of the
    # stem output are contiguous row groups (no in-kernel strided gathers).
    y1 = jnp.dot(cols_ref[...].reshape(m_full, k), ws_ref[...],
                 preferred_element_type=jnp.float32)
    y1 = jnp.maximum(y1 + bs_ref[0], 0.0)

    # ---- block1 pw-expand (ReLU): one M = Bb*Ho*Wo dot ----
    e1 = jnp.dot(y1, w1e_ref[...], preferred_element_type=jnp.float32)
    e1 = jnp.maximum(e1 + b1e_ref[0], 0.0)
    e1 = e1.reshape(bb, 4 * h2 * w2, c1e)

    # Phase interiors go into zero-bordered VMEM scratch so the stride-2 dw conv
    # below uses only stride-1 slices.  Only the 1-wide borders that are read
    # get re-zeroed, every step (cheap; correct for any grid->core split).
    scratches = (e00_sc, e01_sc, e10_sc, e11_sc)
    need_row = (False, False, True, True)     # phase p == 1 reads its top border
    need_col = (False, True, False, True)     # phase q == 1 reads its left border
    zrow = jnp.zeros((bb, 1, w2 + 1, c1e), jnp.float32)
    zcol = jnp.zeros((bb, h2 + 1, 1, c1e), jnp.float32)
    for ph in range(4):
        sc = scratches[ph]
        if need_row[ph]:
            sc[:, 0:1, :, :] = zrow
        if need_col[ph]:
            sc[:, :, 0:1, :] = zcol
        rows = e1[:, ph * h2 * w2:(ph + 1) * h2 * w2, :]
        sc[:, 1:h2 + 1, 1:w2 + 1, :] = rows.reshape(bb, h2, w2, c1e)

    # ---- block1 dw 3x3 stride-2 (+ReLU), computed directly at output res ----
    wd1 = w1d_ref[...]
    acc1 = None
    for dh in range(3):
        for dw in range(3):
            p, sh = _tap_phase_shift(dh)
            q, sw = _tap_phase_shift(dw)
            r0, c0 = 1 - sh, 1 - sw
            tap = scratches[p * 2 + q][:, r0:r0 + h2, c0:c0 + w2, :]
            term = tap * wd1[dh * 3 + dw, :]
            acc1 = term if acc1 is None else acc1 + term
    d1 = jnp.maximum(acc1 + b1d_ref[0], 0.0)

    # ---- block1 pw-project (linear) + block2 pw-expand (ReLU) ----
    y2 = jnp.dot(d1.reshape(m_half, c1e), w1p_ref[...],
                 preferred_element_type=jnp.float32) + b1p_ref[0]
    e2 = jnp.maximum(
        jnp.dot(y2, w2e_ref[...], preferred_element_type=jnp.float32)
        + b2e_ref[0], 0.0)

    # ---- block2 dw 3x3 stride-1 (+ReLU) via zero-bordered VMEM scratch ----
    zrow2 = jnp.zeros((bb, 1, w2 + 2, c2e), jnp.float32)
    zcol2 = jnp.zeros((bb, h2 + 2, 1, c2e), jnp.float32)
    pad_sc[:, 0:1, :, :] = zrow2
    pad_sc[:, h2 + 1:h2 + 2, :, :] = zrow2
    pad_sc[:, :, 0:1, :] = zcol2
    pad_sc[:, :, w2 + 1:w2 + 2, :] = zcol2
    pad_sc[:, 1:h2 + 1, 1:w2 + 1, :] = e2.reshape(bb, h2, w2, c2e)

    wd2 = w2d_ref[...]
    acc2 = None
    for dh in range(3):
        for dw in range(3):
            term = pad_sc[:, dh:dh + h2, dw:dw + w2, :] * wd2[dh * 3 + dw, :]
            acc2 = term if acc2 is None else acc2 + term
    d2 = jnp.maximum(acc2 + b2d_ref[0], 0.0)

    # ---- block2 pw-project (linear) + final 1x1 conv (ReLU) ----
    y3 = jnp.dot(d2.reshape(m_half, c2e), w2p_ref[...],
                 preferred_element_type=jnp.float32) + b2p_ref[0]
    f = jnp.maximum(
        jnp.dot(y3, wf_ref[...], preferred_element_type=jnp.float32)
        + bf_ref[0], 0.0)                                   # (m_half, FEATURE_DIM)

    # ---- adaptive_avg_pool2d((1,1)) + (zero-init) linear head, fused ----
    pooled = jnp.mean(f.reshape(bb, h2 * w2, f.shape[1]), axis=1)   # (Bb, FEAT)
    out = (jnp.dot(pooled, wh_ref[...], preferred_element_type=jnp.float32)
           + bh_ref[0])                                     # (Bb, N_SHAPE_PAD)
    o_ref[...] = out.reshape(bb, 1, out.shape[1])


# -----------------------------------------------------------------------------
# pallas_call wrapper
# -----------------------------------------------------------------------------
def _resident_spec(shape):
    n = len(shape)
    return pl.BlockSpec(tuple(shape), lambda b, _n=n: (0,) * _n)


def _pick_block_batch(bsz):
    # big enough to help fill the MXU M dimension, but keep >= 2 grid steps
    # when possible so dimension_semantics=("parallel",) can use both v7x TCs.
    for bb in (8, 4, 2):
        if bsz % bb == 0 and bsz // bb >= 2:
            return bb
    return 1


def _stem_cols(x_nhwc):
    """im2col of the pad-1/stride-2/3x3 stem, computed only at the strided
    output positions and ordered (b, p, q, a, c) so the block-1 stride-phases
    of the stem output are contiguous row groups inside the kernel."""
    b, h, w, c = x_nhwc.shape
    h2, w2 = h // 4, w // 4
    xp = jnp.pad(x_nhwc, ((0, 0), (1, 1), (1, 1), (0, 0)))
    taps = [xp[:, dh:dh + h:2, dw:dw + w:2, :]
            for dh in range(3) for dw in range(3)]
    cols = jnp.concatenate(taps, axis=-1)                   # (B, Ho, Wo, 9*Cin)
    cols = cols.reshape(b, h2, 2, w2, 2, 9 * c)             # i = 2a+p, j = 2cc+q
    cols = jnp.transpose(cols, (0, 2, 4, 1, 3, 5))          # (B, p, q, a, cc, K)
    return cols.reshape(b, 4 * h2 * w2, 9 * c)


def shape_encoder_forward(params, img_nchw):
    """img_nchw: (B, 3, H, W) float32 (PyTorch layout).  Returns dict."""
    bsz, cin, h, w = img_nchw.shape
    assert h % 4 == 0 and w % 4 == 0, "spatial dims must be multiples of 4"
    h2, w2 = h // 4, w // 4
    x = jnp.transpose(img_nchw, (0, 2, 3, 1))               # NHWC
    cols = _stem_cols(x)                                    # (B, 4*h2*w2, 9*cin)

    bb = _pick_block_batch(bsz)
    weights = [params[k] for k in _WEIGHT_KEYS]
    n_pad = params["head_w"].shape[1]

    out = pl.pallas_call(
        _encoder_kernel,
        out_shape=jax.ShapeDtypeStruct((bsz, 1, n_pad), jnp.float32),
        grid=(bsz // bb,),
        in_specs=[pl.BlockSpec((bb, 4 * h2 * w2, 9 * cin), lambda b: (b, 0, 0))]
        + [_resident_spec(a.shape) for a in weights],
        out_specs=pl.BlockSpec((bb, 1, n_pad), lambda b: (b, 0, 0)),
        scratch_shapes=[pltpu.VMEM((bb, h2 + 1, w2 + 1, C1_EXP), jnp.float32)
                        for _ in range(4)]
        + [pltpu.VMEM((bb, h2 + 2, w2 + 2, C2_EXP), jnp.float32)],
        compiler_params=pltpu.CompilerParams(
            dimension_semantics=("parallel",)),
    )(cols, *weights)

    return {"shape_params": out.reshape(bsz, n_pad)[:, :N_SHAPE]}


# -----------------------------------------------------------------------------
# Synthetic parameters (stand-in for the timm backbone) + plain-XLA reference
# -----------------------------------------------------------------------------
def init_params(key):
    ks = iter(jax.random.split(key, 24))

    def rnd(shape, scale=0.25):
        return scale * jax.random.normal(next(ks), shape, jnp.float32)

    return {
        # stem: 3x3 s2 conv, 3 -> C_STEM, ReLU.  rows = (dh*3+dw)*3 + cin.
        "stem_w": rnd((9 * 3, C_STEM)), "stem_b": rnd((1, C_STEM)),
        # block1: pw 16->32 ReLU, dw3x3 s2 ReLU, pw 32->24 linear
        "b1_exp_w": rnd((C_STEM, C1_EXP)), "b1_exp_b": rnd((1, C1_EXP)),
        "b1_dw_w": rnd((9, C1_EXP)), "b1_dw_b": rnd((1, C1_EXP)),
        "b1_proj_w": rnd((C1_EXP, C1_OUT)), "b1_proj_b": rnd((1, C1_OUT)),
        # block2: pw 24->48 ReLU, dw3x3 s1 ReLU, pw 48->32 linear
        "b2_exp_w": rnd((C1_OUT, C2_EXP)), "b2_exp_b": rnd((1, C2_EXP)),
        "b2_dw_w": rnd((9, C2_EXP)), "b2_dw_b": rnd((1, C2_EXP)),
        "b2_proj_w": rnd((C2_EXP, C2_OUT)), "b2_proj_b": rnd((1, C2_OUT)),
        # final 1x1 conv -> FEATURE_DIM, ReLU
        "final_w": rnd((C2_OUT, FEATURE_DIM)), "final_b": rnd((1, FEATURE_DIM)),
        # shape head: Linear(feature_dim, n_shape) -- zeroed by init_weights();
        # padded to N_SHAPE_PAD lanes, sliced back to N_SHAPE outside the kernel.
        "head_w": jnp.zeros((FEATURE_DIM, N_SHAPE_PAD), jnp.float32),
        "head_b": jnp.zeros((1, N_SHAPE_PAD), jnp.float32),
    }


def _reference_forward(params, img_nchw):
    # Straightforward pad+shift conv definition in plain XLA (no Pallas),
    # used only as a numerical cross-check of the fused kernel.
    x = jnp.transpose(img_nchw, (0, 2, 3, 1))

    def conv3x3(t, w9, b, stride):
        _, hh, ww, _ = t.shape
        tp = jnp.pad(t, ((0, 0), (1, 1), (1, 1), (0, 0)))
        cols = jnp.concatenate(
            [tp[:, dh:dh + hh, dw:dw + ww, :]
             for dh in range(3) for dw in range(3)], axis=-1)
        if stride == 2:
            cols = cols[:, ::2, ::2, :]
        return jnp.einsum("bhwk,kn->bhwn", cols, w9) + b[0]

    def dw3x3(t, wd, bd, stride):
        _, hh, ww, _ = t.shape
        tp = jnp.pad(t, ((0, 0), (1, 1), (1, 1), (0, 0)))
        acc = sum(tp[:, dh:dh + hh, dw:dw + ww, :] * wd[dh * 3 + dw]
                  for dh in range(3) for dw in range(3))
        y = jnp.maximum(acc + bd[0], 0.0)
        return y[:, ::2, ::2, :] if stride == 2 else y

    def pw(t, w, b, act):
        y = jnp.einsum("bhwc,cn->bhwn", t, w) + b[0]
        return jnp.maximum(y, 0.0) if act else y

    y = jnp.maximum(conv3x3(x, params["stem_w"], params["stem_b"], 2), 0.0)
    y = pw(y, params["b1_exp_w"], params["b1_exp_b"], True)
    y = dw3x3(y, params["b1_dw_w"], params["b1_dw_b"], 2)
    y = pw(y, params["b1_proj_w"], params["b1_proj_b"], False)
    y = pw(y, params["b2_exp_w"], params["b2_exp_b"], True)
    y = dw3x3(y, params["b2_dw_w"], params["b2_dw_b"], 1)
    y = pw(y, params["b2_proj_w"], params["b2_proj_b"], False)
    f = pw(y, params["final_w"], params["final_b"], True)
    pooled = jnp.mean(f, axis=(1, 2))
    return (pooled @ params["head_w"] + params["head_b"])[:, :N_SHAPE]


# -----------------------------------------------------------------------------
if __name__ == "__main__":
    key = jax.random.PRNGKey(0)
    k_img, k_par, k_hw, k_hb = jax.random.split(key, 4)

    img = jax.random.normal(k_img, (2, 3, 32, 32), jnp.float32)  # NCHW, like torch
    params = init_params(k_par)

    fwd = jax.jit(shape_encoder_forward)
    out = fwd(params, img)
    shape_params = jax.block_until_ready(out["shape_params"])

    assert shape_params.shape == (2, N_SHAPE), shape_params.shape
    # init_weights() zeroes the head, so the module output is exactly zero.
    assert bool(jnp.all(shape_params == 0.0))

    # Cross-check the fused backbone kernel against the plain-XLA reference
    # (with a non-zero head so the comparison is not trivially 0 == 0).
    params_chk = dict(params)
    params_chk["head_w"] = 0.25 * jax.random.normal(
        k_hw, (FEATURE_DIM, N_SHAPE_PAD), jnp.float32)
    params_chk["head_b"] = 0.25 * jax.random.normal(
        k_hb, (1, N_SHAPE_PAD), jnp.float32)
    got = jax.block_until_ready(fwd(params_chk, img)["shape_params"])
    ref = jax.block_until_ready(jax.jit(_reference_forward)(params_chk, img))
    err = float(jnp.max(jnp.abs(got - ref)))
    tol = 1e-3 + 5e-2 * float(jnp.max(jnp.abs(ref)))
    assert err <= tol, (err, tol)

    print("KERNEL_OK")
</pallas_src>

<mosaic_0001>
module attributes {stable_mosaic.version = 11 : i64} {
  func.func @_encoder_kernel(%arg0: i32, %arg1: memref<1x256x27xf32, #tpu.memory_space<vmem>>, %arg2: memref<27x16xf32, #tpu.memory_space<vmem>>, %arg3: memref<1x16xf32, #tpu.memory_space<vmem>>, %arg4: memref<16x32xf32, #tpu.memory_space<vmem>>, %arg5: memref<1x32xf32, #tpu.memory_space<vmem>>, %arg6: memref<9x32xf32, #tpu.memory_space<vmem>>, %arg7: memref<1x32xf32, #tpu.memory_space<vmem>>, %arg8: memref<32x24xf32, #tpu.memory_space<vmem>>, %arg9: memref<1x24xf32, #tpu.memory_space<vmem>>, %arg10: memref<24x48xf32, #tpu.memory_space<vmem>>, %arg11: memref<1x48xf32, #tpu.memory_space<vmem>>, %arg12: memref<9x48xf32, #tpu.memory_space<vmem>>, %arg13: memref<1x48xf32, #tpu.memory_space<vmem>>, %arg14: memref<48x32xf32, #tpu.memory_space<vmem>>, %arg15: memref<1x32xf32, #tpu.memory_space<vmem>>, %arg16: memref<32x64xf32, #tpu.memory_space<vmem>>, %arg17: memref<1x64xf32, #tpu.memory_space<vmem>>, %arg18: memref<64x384xf32, #tpu.memory_space<vmem>>, %arg19: memref<1x384xf32, #tpu.memory_space<vmem>>, %arg20: memref<1x1x384xf32, #tpu.memory_space<vmem>>, %arg21: memref<1x9x9x32xf32, #tpu.memory_space<vmem>>, %arg22: memref<1x9x9x32xf32, #tpu.memory_space<vmem>>, %arg23: memref<1x9x9x32xf32, #tpu.memory_space<vmem>>, %arg24: memref<1x9x9x32xf32, #tpu.memory_space<vmem>>, %arg25: memref<1x10x10x48xf32, #tpu.memory_space<vmem>>) attributes {dimension_semantics = [#tpu.dimension_semantics<parallel>], iteration_bounds = array<i64: 2>, scalar_prefetch = 0 : i64, scratch_operands = 5 : i64, tpu.core_type = #tpu.core_type<tc>, window_params = [{transform_indices = @transform_0, window_bounds = array<i64: 1, 256, 27>}, {pipeline_mode = #tpu.pipeline_mode<synchronous>, transform_indices = @transform_1, window_bounds = array<i64: 27, 16>}, {pipeline_mode = #tpu.pipeline_mode<synchronous>, transform_indices = @transform_2, window_bounds = array<i64: 1, 16>}, {pipeline_mode = #tpu.pipeline_mode<synchronous>, transform_indices = @transform_3, window_bounds = array<i64: 16, 32>}, {pipeline_mode = #tpu.pipeline_mode<synchronous>, transform_indices = @transform_4, window_bounds = array<i64: 1, 32>}, {pipeline_mode = #tpu.pipeline_mode<synchronous>, transform_indices = @transform_5, window_bounds = array<i64: 9, 32>}, {pipeline_mode = #tpu.pipeline_mode<synchronous>, transform_indices = @transform_6, window_bounds = array<i64: 1, 32>}, {pipeline_mode = #tpu.pipeline_mode<synchronous>, transform_indices = @transform_7, window_bounds = array<i64: 32, 24>}, {pipeline_mode = #tpu.pipeline_mode<synchronous>, transform_indices = @transform_8, window_bounds = array<i64: 1, 24>}, {pipeline_mode = #tpu.pipeline_mode<synchronous>, transform_indices = @transform_9, window_bounds = array<i64: 24, 48>}, {pipeline_mode = #tpu.pipeline_mode<synchronous>, transform_indices = @transform_10, window_bounds = array<i64: 1, 48>}, {pipeline_mode = #tpu.pipeline_mode<synchronous>, transform_indices = @transform_11, window_bounds = array<i64: 9, 48>}, {pipeline_mode = #tpu.pipeline_mode<synchronous>, transform_indices = @transform_12, window_bounds = array<i64: 1, 48>}, {pipeline_mode = #tpu.pipeline_mode<synchronous>, transform_indices = @transform_13, window_bounds = array<i64: 48, 32>}, {pipeline_mode = #tpu.pipeline_mode<synchronous>, transform_indices = @transform_14, window_bounds = array<i64: 1, 32>}, {pipeline_mode = #tpu.pipeline_mode<synchronous>, transform_indices = @transform_15, window_bounds = array<i64: 32, 64>}, {pipeline_mode = #tpu.pipeline_mode<synchronous>, transform_indices = @transform_16, window_bounds = array<i64: 1, 64>}, {pipeline_mode = #tpu.pipeline_mode<synchronous>, transform_indices = @transform_17, window_bounds = array<i64: 64, 384>}, {pipeline_mode = #tpu.pipeline_mode<synchronous>, transform_indices = @transform_18, window_bounds = array<i64: 1, 384>}, {transform_indices = @transform_19, window_bounds = array<i64: 1, 1, 384>}]} {
    %c0 = arith.constant 0 : index
    %c0_0 = arith.constant 0 : index
    %c0_1 = arith.constant 0 : index
    %0 = vector.load %arg1[%c0, %c0_0, %c0_1] : memref<1x256x27xf32, #tpu.memory_space<vmem>>, vector<1x256x27xf32>
    %1 = vector.shape_cast %0 : vector<1x256x27xf32> to vector<256x27xf32>
    %c0_2 = arith.constant 0 : index
    %c0_3 = arith.constant 0 : index
    %2 = vector.load %arg2[%c0_2, %c0_3] : memref<27x16xf32, #tpu.memory_space<vmem>>, vector<27x16xf32>
    %cst = arith.constant dense<0.000000e+00> : vector<256x16xf32>
    %3 = tpu.matmul %1, %2, %cst {dimension_numbers = #tpu.dot_dimension_numbers<[1], [0], [0], [1], [0, 0, 1, 1], [], []>} : vector<256x27xf32>, vector<27x16xf32>, vector<256x16xf32> -> vector<256x16xf32>
    %c0_4 = arith.constant 0 : index
    %c0_5 = arith.constant 0 : index
    %4 = vector.load %arg3[%c0_4, %c0_5] : memref<1x16xf32, #tpu.memory_space<vmem>>, vector<1x16xf32>
    %5 = vector.shape_cast %4 : vector<1x16xf32> to vector<16xf32>
    %6 = vector.shape_cast %5 : vector<16xf32> to vector<1x16xf32>
    %7 = vector.broadcast %6 : vector<1x16xf32> to vector<256x16xf32>
    %8 = arith.addf %3, %7 : vector<256x16xf32>
    %cst_6 = arith.constant 0.000000e+00 : f32
    %9 = vector.broadcast %cst_6 : f32 to vector<256x16xf32>
    %10 = arith.maximumf %8, %9 : vector<256x16xf32>
    %c0_7 = arith.constant 0 : index
    %c0_8 = arith.constant 0 : index
    %11 = vector.load %arg4[%c0_7, %c0_8] : memref<16x32xf32, #tpu.memory_space<vmem>>, vector<16x32xf32>
    %cst_9 = arith.constant dense<0.000000e+00> : vector<256x32xf32>
    %12 = tpu.matmul %10, %11, %cst_9 {dimension_numbers = #tpu.dot_dimension_numbers<[1], [0], [0], [1], [0, 0, 1, 1], [], []>} : vector<256x16xf32>, vector<16x32xf32>, vector<256x32xf32> -> vector<256x32xf32>
    %c0_10 = arith.constant 0 : index
    %c0_11 = arith.constant 0 : index
    %13 = vector.load %arg5[%c0_10, %c0_11] : memref<1x32xf32, #tpu.memory_space<vmem>>, vector<1x32xf32>
    %14 = vector.shape_cast %13 : vector<1x32xf32> to vector<32xf32>
    %15 = vector.shape_cast %14 : vector<32xf32> to vector<1x32xf32>
    %16 = vector.broadcast %15 : vector<1x32xf32> to vector<256x32xf32>
    %17 = arith.addf %12, %16 : vector<256x32xf32>
    %cst_12 = arith.constant 0.000000e+00 : f32
    %18 = vector.broadcast %cst_12 : f32 to vector<256x32xf32>
    %19 = arith.maximumf %17, %18 : vector<256x32xf32>
    %20 = vector.shape_cast %19 : vector<256x32xf32> to vector<1x256x32xf32>
    %cst_13 = arith.constant 0.000000e+00 : f32
    %21 = vector.broadcast %cst_13 : f32 to vector<1x1x9x32xf32>
    %cst_14 = arith.constant 0.000000e+00 : f32
    %22 = vector.broadcast %cst_14 : f32 to vector<1x9x1x32xf32>
    %23 = vector.extract_strided_slice %20 {offsets = [0, 0, 0], sizes = [1, 64, 32], strides = [1, 1, 1]} : vector<1x256x32xf32> to vector<1x64x32xf32>
    %24 = vector.shape_cast %23 : vector<1x64x32xf32> to vector<1x8x8x32xf32>
    %c0_15 = arith.constant 0 : index
    %c1 = arith.constant 1 : index
    %c1_16 = arith.constant 1 : index
    %c0_17 = arith.constant 0 : index
    %25 = vector.load %arg21[%c0_15, %c1, %c1_16, %c0_17] : memref<1x9x9x32xf32, #tpu.memory_space<vmem>>, vector<1x8x8x32xf32>
    tpu.vector_store %arg21[%c0_15, %c1, %c1_16, %c0_17], %24 {strides = array<i32>} : memref<1x9x9x32xf32, #tpu.memory_space<vmem>>, vector<1x8x8x32xf32>,
    %c0_18 = arith.constant 0 : index
    %c0_19 = arith.constant 0 : index
    %c0_20 = arith.constant 0 : index
    %c0_21 = arith.constant 0 : index
    %26 = vector.load %arg22[%c0_18, %c0_19, %c0_20, %c0_21] : memref<1x9x9x32xf32, #tpu.memory_space<vmem>>, vector<1x9x1x32xf32>
    tpu.vector_store %arg22[%c0_18, %c0_19, %c0_20, %c0_21], %22 {strides = array<i32>} : memref<1x9x9x32xf32, #tpu.memory_space<vmem>>, vector<1x9x1x32xf32>,
    %27 = vector.extract_strided_slice %20 {offsets = [0, 64, 0], sizes = [1, 64, 32], strides = [1, 1, 1]} : vector<1x256x32xf32> to vector<1x64x32xf32>
    %28 = vector.shape_cast %27 : vector<1x64x32xf32> to vector<1x8x8x32xf32>
    %c0_22 = arith.constant 0 : index
    %c1_23 = arith.constant 1 : index
    %c1_24 = arith.constant 1 : index
    %c0_25 = arith.constant 0 : index
    %29 = vector.load %arg22[%c0_22, %c1_23, %c1_24, %c0_25] : memref<1x9x9x32xf32, #tpu.memory_space<vmem>>, vector<1x8x8x32xf32>
    tpu.vector_store %arg22[%c0_22, %c1_23, %c1_24, %c0_25], %28 {strides = array<i32>} : memref<1x9x9x32xf32, #tpu.memory_space<vmem>>, vector<1x8x8x32xf32>,
    %c0_26 = arith.constant 0 : index
    %c0_27 = arith.constant 0 : index
    %c0_28 = arith.constant 0 : index
    %c0_29 = arith.constant 0 : index
    %30 = vector.load %arg23[%c0_26, %c0_27, %c0_28, %c0_29] : memref<1x9x9x32xf32, #tpu.memory_space<vmem>>, vector<1x1x9x32xf32>
    tpu.vector_store %arg23[%c0_26, %c0_27, %c0_28, %c0_29], %21 {strides = array<i32>} : memref<1x9x9x32xf32, #tpu.memory_space<vmem>>, vector<1x1x9x32xf32>,
    %31 = vector.extract_strided_slice %20 {offsets = [0, 128, 0], sizes = [1, 64, 32], strides = [1, 1, 1]} : vector<1x256x32xf32> to vector<1x64x32xf32>
    %32 = vector.shape_cast %31 : vector<1x64x32xf32> to vector<1x8x8x32xf32>
    %c0_30 = arith.constant 0 : index
    %c1_31 = arith.constant 1 : index
    %c1_32 = arith.constant 1 : index
    %c0_33 = arith.constant 0 : index
    %33 = vector.load %arg23[%c0_30, %c1_31, %c1_32, %c0_33] : memref<1x9x9x32xf32, #tpu.memory_space<vmem>>, vector<1x8x8x32xf32>
    tpu.vector_store %arg23[%c0_30, %c1_31, %c1_32, %c0_33], %32 {strides = array<i32>} : memref<1x9x9x32xf32, #tpu.memory_space<vmem>>, vector<1x8x8x32xf32>,
    %c0_34 = arith.constant 0 : index
    %c0_35 = arith.constant 0 : index
    %c0_36 = arith.constant 0 : index
    %c0_37 = arith.constant 0 : index
    %34 = vector.load %arg24[%c0_34, %c0_35, %c0_36, %c0_37] : memref<1x9x9x32xf32, #tpu.memory_space<vmem>>, vector<1x1x9x32xf32>
    tpu.vector_store %arg24[%c0_34, %c0_35, %c0_36, %c0_37], %21 {strides = array<i32>} : memref<1x9x9x32xf32, #tpu.memory_space<vmem>>, vector<1x1x9x32xf32>,
    %c0_38 = arith.constant 0 : index
    %c0_39 = arith.constant 0 : index
    %c0_40 = arith.constant 0 : index
    %c0_41 = arith.constant 0 : index
    %35 = vector.load %arg24[%c0_38, %c0_39, %c0_40, %c0_41] : memref<1x9x9x32xf32, #tpu.memory_space<vmem>>, vector<1x9x1x32xf32>
    tpu.vector_store %arg24[%c0_38, %c0_39, %c0_40, %c0_41], %22 {strides = array<i32>} : memref<1x9x9x32xf32, #tpu.memory_space<vmem>>, vector<1x9x1x32xf32>,
    %36 = vector.extract_strided_slice %20 {offsets = [0, 192, 0], sizes = [1, 64, 32], strides = [1, 1, 1]} : vector<1x256x32xf32> to vector<1x64x32xf32>
    %37 = vector.shape_cast %36 : vector<1x64x32xf32> to vector<1x8x8x32xf32>
    %c0_42 = arith.constant 0 : index
    %c1_43 = arith.constant 1 : index
    %c1_44 = arith.constant 1 : index
    %c0_45 = arith.constant 0 : index
    %38 = vector.load %arg24[%c0_42, %c1_43, %c1_44, %c0_45] : memref<1x9x9x32xf32, #tpu.memory_space<vmem>>, vector<1x8x8x32xf32>
    tpu.vector_store %arg24[%c0_42, %c1_43, %c1_44, %c0_45], %37 {strides = array<i32>} : memref<1x9x9x32xf32, #tpu.memory_space<vmem>>, vector<1x8x8x32xf32>,
    %c0_46 = arith.constant 0 : index
    %c0_47 = arith.constant 0 : index
    %39 = vector.load %arg6[%c0_46, %c0_47] : memref<9x32xf32, #tpu.memory_space<vmem>>, vector<9x32xf32>
    %c0_48 = arith.constant 0 : index
    %c0_49 = arith.constant 0 : index
    %c0_50 = arith.constant 0 : index
    %c0_51 = arith.constant 0 : index
    %40 = vector.load %arg24[%c0_48, %c0_49, %c0_50, %c0_51] : memref<1x9x9x32xf32, #tpu.memory_space<vmem>>, vector<1x8x8x32xf32>
    %41 = vector.extract_strided_slice %39 {offsets = [0, 0], sizes = [1, 32], strides = [1, 1]} : vector<9x32xf32> to vector<1x32xf32>
    %42 = vector.shape_cast %41 : vector<1x32xf32> to vector<32xf32>
    %43 = vector.shape_cast %42 : vector<32xf32> to vector<1x1x1x32xf32>
    %44 = vector.broadcast %43 : vector<1x1x1x32xf32> to vector<1x8x8x32xf32>
    %45 = arith.mulf %40, %44 : vector<1x8x8x32xf32>
    %c0_52 = arith.constant 0 : index
    %c0_53 = arith.constant 0 : index
    %c1_54 = arith.constant 1 : index
    %c0_55 = arith.constant 0 : index
    %46 = vector.load %arg23[%c0_52, %c0_53, %c1_54, %c0_55] : memref<1x9x9x32xf32, #tpu.memory_space<vmem>>, vector<1x8x8x32xf32>
    %47 = vector.extract_strided_slice %39 {offsets = [1, 0], sizes = [1, 32], strides = [1, 1]} : vector<9x32xf32> to vector<1x32xf32>
    %48 = vector.shape_cast %47 : vector<1x32xf32> to vector<32xf32>
    %49 = vector.shape_cast %48 : vector<32xf32> to vector<1x1x1x32xf32>
    %50 = vector.broadcast %49 : vector<1x1x1x32xf32> to vector<1x8x8x32xf32>
    %51 = arith.mulf %46, %50 : vector<1x8x8x32xf32>
    %52 = arith.addf %45, %51 : vector<1x8x8x32xf32>
    %c0_56 = arith.constant 0 : index
    %c0_57 = arith.constant 0 : index
    %c1_58 = arith.constant 1 : index
    %c0_59 = arith.constant 0 : index
    %53 = vector.load %arg24[%c0_56, %c0_57, %c1_58, %c0_59] : memref<1x9x9x32xf32, #tpu.memory_space<vmem>>, vector<1x8x8x32xf32>
    %54 = vector.extract_strided_slice %39 {offsets = [2, 0], sizes = [1, 32], strides = [1, 1]} : vector<9x32xf32> to vector<1x32xf32>
    %55 = vector.shape_cast %54 : vector<1x32xf32> to vector<32xf32>
    %56 = vector.shape_cast %55 : vector<32xf32> to vector<1x1x1x32xf32>
    %57 = vector.broadcast %56 : vector<1x1x1x32xf32> to vector<1x8x8x32xf32>
    %58 = arith.mulf %53, %57 : vector<1x8x8x32xf32>
    %59 = arith.addf %52, %58 : vector<1x8x8x32xf32>
    %c0_60 = arith.constant 0 : index
    %c1_61 = arith.constant 1 : index
    %c0_62 = arith.constant 0 : index
    %c0_63 = arith.constant 0 : index
    %60 = vector.load %arg22[%c0_60, %c1_61, %c0_62, %c0_63] : memref<1x9x9x32xf32, #tpu.memory_space<vmem>>, vector<1x8x8x32xf32>
    %61 = vector.extract_strided_slice %39 {offsets = [3, 0], sizes = [1, 32], strides = [1, 1]} : vector<9x32xf32> to vector<1x32xf32>
    %62 = vector.shape_cast %61 : vector<1x32xf32> to vector<32xf32>
    %63 = vector.shape_cast %62 : vector<32xf32> to vector<1x1x1x32xf32>
    %64 = vector.broadcast %63 : vector<1x1x1x32xf32> to vector<1x8x8x32xf32>
    %65 = arith.mulf %60, %64 : vector<1x8x8x32xf32>
    %66 = arith.addf %59, %65 : vector<1x8x8x32xf32>
    %c0_64 = arith.constant 0 : index
    %c1_65 = arith.constant 1 : index
    %c1_66 = arith.constant 1 : index
    %c0_67 = arith.constant 0 : index
    %67 = vector.load %arg21[%c0_64, %c1_65, %c1_66, %c0_67] : memref<1x9x9x32xf32, #tpu.memory_space<vmem>>, vector<1x8x8x32xf32>
    %68 = vector.extract_strided_slice %39 {offsets = [4, 0], sizes = [1, 32], strides = [1, 1]} : vector<9x32xf32> to vector<1x32xf32>
    %69 = vector.shape_cast %68 : vector<1x32xf32> to vector<32xf32>
    %70 = vector.shape_cast %69 : vector<32xf32> to vector<1x1x1x32xf32>
    %71 = vector.broadcast %70 : vector<1x1x1x32xf32> to vector<1x8x8x32xf32>
    %72 = arith.mulf %67, %71 : vector<1x8x8x32xf32>
    %73 = arith.addf %66, %72 : vector<1x8x8x32xf32>
    %c0_68 = arith.constant 0 : index
    %c1_69 = arith.constant 1 : index
    %c1_70 = arith.constant 1 : index
    %c0_71 = arith.constant 0 : index
    %74 = vector.load %arg22[%c0_68, %c1_69, %c1_70, %c0_71] : memref<1x9x9x32xf32, #tpu.memory_space<vmem>>, vector<1x8x8x32xf32>
    %75 = vector.extract_strided_slice %39 {offsets = [5, 0], sizes = [1, 32], strides = [1, 1]} : vector<9x32xf32> to vector<1x32xf32>
    %76 = vector.shape_cast %75 : vector<1x32xf32> to vector<32xf32>
    %77 = vector.shape_cast %76 : vector<32xf32> to vector<1x1x1x32xf32>
    %78 = vector.broadcast %77 : vector<1x1x1x32xf32> to vector<1x8x8x32xf32>
    %79 = arith.mulf %74, %78 : vector<1x8x8x32xf32>
    %80 = arith.addf %73, %79 : vector<1x8x8x32xf32>
    %c0_72 = arith.constant 0 : index
    %c1_73 = arith.constant 1 : index
    %c0_74 = arith.constant 0 : index
    %c0_75 = arith.constant 0 : index
    %81 = vector.load %arg24[%c0_72, %c1_73, %c0_74, %c0_75] : memref<1x9x9x32xf32, #tpu.memory_space<vmem>>, vector<1x8x8x32xf32>
    %82 = vector.extract_strided_slice %39 {offsets = [6, 0], sizes = [1, 32], strides = [1, 1]} : vector<9x32xf32> to vector<1x32xf32>
    %83 = vector.shape_cast %82 : vector<1x32xf32> to vector<32xf32>
    %84 = vector.shape_cast %83 : vector<32xf32> to vector<1x1x1x32xf32>
    %85 = vector.broadcast %84 : vector<1x1x1x32xf32> to vector<1x8x8x32xf32>
    %86 = arith.mulf %81, %85 : vector<1x8x8x32xf32>
    %87 = arith.addf %80, %86 : vector<1x8x8x32xf32>
    %c0_76 = arith.constant 0 : index
    %c1_77 = arith.constant 1 : index
    %c1_78 = arith.constant 1 : index
    %c0_79 = arith.constant 0 : index
    %88 = vector.load %arg23[%c0_76, %c1_77, %c1_78, %c0_79] : memref<1x9x9x32xf32, #tpu.memory_space<vmem>>, vector<1x8x8x32xf32>
    %89 = vector.extract_strided_slice %39 {offsets = [7, 0], sizes = [1, 32], strides = [1, 1]} : vector<9x32xf32> to vector<1x32xf32>
    %90 = vector.shape_cast %89 : vector<1x32xf32> to vector<32xf32>
    %91 = vector.shape_cast %90 : vector<32xf32> to vector<1x1x1x32xf32>
    %92 = vector.broadcast %91 : vector<1x1x1x32xf32> to vector<1x8x8x32xf32>
    %93 = arith.mulf %88, %92 : vector<1x8x8x32xf32>
    %94 = arith.addf %87, %93 : vector<1x8x8x32xf32>
    %c0_80 = arith.constant 0 : index
    %c1_81 = arith.constant 1 : index
    %c1_82 = arith.constant 1 : index
    %c0_83 = arith.constant 0 : index
    %95 = vector.load %arg24[%c0_80, %c1_81, %c1_82, %c0_83] : memref<1x9x9x32xf32, #tpu.memory_space<vmem>>, vector<1x8x8x32xf32>
    %96 = vector.extract_strided_slice %39 {offsets = [8, 0], sizes = [1, 32], strides = [1, 1]} : vector<9x32xf32> to vector<1x32xf32>
    %97 = vector.shape_cast %96 : vector<1x32xf32> to vector<32xf32>
    %98 = vector.shape_cast %97 : vector<32xf32> to vector<1x1x1x32xf32>
    %99 = vector.broadcast %98 : vector<1x1x1x32xf32> to vector<1x8x8x32xf32>
    %100 = arith.mulf %95, %99 : vector<1x8x8x32xf32>
    %101 = arith.addf %94, %100 : vector<1x8x8x32xf32>
    %c0_84 = arith.constant 0 : index
    %c0_85 = arith.constant 0 : index
    %102 = vector.load %arg7[%c0_84, %c0_85] : memref<1x32xf32, #tpu.memory_space<vmem>>, vector<1x32xf32>
    %103 = vector.shape_cast %102 : vector<1x32xf32> to vector<32xf32>
    %104 = vector.shape_cast %103 : vector<32xf32> to vector<1x1x1x32xf32>
    %105 = vector.broadcast %104 : vector<1x1x1x32xf32> to vector<1x8x8x32xf32>
    %106 = arith.addf %101, %105 : vector<1x8x8x32xf32>
    %cst_86 = arith.constant 0.000000e+00 : f32
    %107 = vector.broadcast %cst_86 : f32 to vector<1x8x8x32xf32>
    %108 = arith.maximumf %106, %107 : vector<1x8x8x32xf32>
    %109 = vector.shape_cast %108 : vector<1x8x8x32xf32> to vector<64x32xf32>
    %c0_87 = arith.constant 0 : index
    %c0_88 = arith.constant 0 : index
    %110 = vector.load %arg8[%c0_87, %c0_88] : memref<32x24xf32, #tpu.memory_space<vmem>>, vector<32x24xf32>
    %cst_89 = arith.constant dense<0.000000e+00> : vector<64x24xf32>
    %111 = tpu.matmul %109, %110, %cst_89 {dimension_numbers = #tpu.dot_dimension_numbers<[1], [0], [0], [1], [0, 0, 1, 1], [], []>} : vector<64x32xf32>, vector<32x24xf32>, vector<64x24xf32> -> vector<64x24xf32>
    %c0_90 = arith.constant 0 : index
    %c0_91 = arith.constant 0 : index
    %112 = vector.load %arg9[%c0_90, %c0_91] : memref<1x24xf32, #tpu.memory_space<vmem>>, vector<1x24xf32>
    %113 = vector.shape_cast %112 : vector<1x24xf32> to vector<24xf32>
    %114 = vector.shape_cast %113 : vector<24xf32> to vector<1x24xf32>
    %115 = vector.broadcast %114 : vector<1x24xf32> to vector<64x24xf32>
    %116 = arith.addf %111, %115 : vector<64x24xf32>
    %c0_92 = arith.constant 0 : index
    %c0_93 = arith.constant 0 : index
    %117 = vector.load %arg10[%c0_92, %c0_93] : memref<24x48xf32, #tpu.memory_space<vmem>>, vector<24x48xf32>
    %cst_94 = arith.constant dense<0.000000e+00> : vector<64x48xf32>
    %118 = tpu.matmul %116, %117, %cst_94 {dimension_numbers = #tpu.dot_dimension_numbers<[1], [0], [0], [1], [0, 0, 1, 1], [], []>} : vector<64x24xf32>, vector<24x48xf32>, vector<64x48xf32> -> vector<64x48xf32>
    %c0_95 = arith.constant 0 : index
    %c0_96 = arith.constant 0 : index
    %119 = vector.load %arg11[%c0_95, %c0_96] : memref<1x48xf32, #tpu.memory_space<vmem>>, vector<1x48xf32>
    %120 = vector.shape_cast %119 : vector<1x48xf32> to vector<48xf32>
    %121 = vector.shape_cast %120 : vector<48xf32> to vector<1x48xf32>
    %122 = vector.broadcast %121 : vector<1x48xf32> to vector<64x48xf32>
    %123 = arith.addf %118, %122 : vector<64x48xf32>
    %cst_97 = arith.constant 0.000000e+00 : f32
    %124 = vector.broadcast %cst_97 : f32 to vector<64x48xf32>
    %125 = arith.maximumf %123, %124 : vector<64x48xf32>
    %cst_98 = arith.constant 0.000000e+00 : f32
    %126 = vector.broadcast %cst_98 : f32 to vector<1x1x10x48xf32>
    %cst_99 = arith.constant 0.000000e+00 : f32
    %127 = vector.broadcast %cst_99 : f32 to vector<1x10x1x48xf32>
    %c0_100 = arith.constant 0 : index
    %c0_101 = arith.constant 0 : index
    %c0_102 = arith.constant 0 : index
    %c0_103 = arith.constant 0 : index
    %128 = vector.load %arg25[%c0_100, %c0_101, %c0_102, %c0_103] : memref<1x10x10x48xf32, #tpu.memory_space<vmem>>, vector<1x1x10x48xf32>
    tpu.vector_store %arg25[%c0_100, %c0_101, %c0_102, %c0_103], %126 {strides = array<i32>} : memref<1x10x10x48xf32, #tpu.memory_space<vmem>>, vector<1x1x10x48xf32>,
    %c0_104 = arith.constant 0 : index
    %c9 = arith.constant 9 : index
    %c0_105 = arith.constant 0 : index
    %c0_106 = arith.constant 0 : index
    %129 = vector.load %arg25[%c0_104, %c9, %c0_105, %c0_106] : memref<1x10x10x48xf32, #tpu.memory_space<vmem>>, vector<1x1x10x48xf32>
    tpu.vector_store %arg25[%c0_104, %c9, %c0_105, %c0_106], %126 {strides = array<i32>} : memref<1x10x10x48xf32, #tpu.memory_space<vmem>>, vector<1x1x10x48xf32>,
    %c0_107 = arith.constant 0 : index
    %c0_108 = arith.constant 0 : index
    %c0_109 = arith.constant 0 : index
    %c0_110 = arith.constant 0 : index
    %130 = vector.load %arg25[%c0_107, %c0_108, %c0_109, %c0_110] : memref<1x10x10x48xf32, #tpu.memory_space<vmem>>, vector<1x10x1x48xf32>
    tpu.vector_store %arg25[%c0_107, %c0_108, %c0_109, %c0_110], %127 {strides = array<i32>} : memref<1x10x10x48xf32, #tpu.memory_space<vmem>>, vector<1x10x1x48xf32>,
    %c0_111 = arith.constant 0 : index
    %c0_112 = arith.constant 0 : index
    %c9_113 = arith.constant 9 : index
    %c0_114 = arith.constant 0 : index
    %131 = vector.load %arg25[%c0_111, %c0_112, %c9_113, %c0_114] : memref<1x10x10x48xf32, #tpu.memory_space<vmem>>, vector<1x10x1x48xf32>
    tpu.vector_store %arg25[%c0_111, %c0_112, %c9_113, %c0_114], %127 {strides = array<i32>} : memref<1x10x10x48xf32, #tpu.memory_space<vmem>>, vector<1x10x1x48xf32>,
    %132 = vector.shape_cast %125 : vector<64x48xf32> to vector<1x8x8x48xf32>
    %c0_115 = arith.constant 0 : index
    %c1_116 = arith.constant 1 : index
    %c1_117 = arith.constant 1 : index
    %c0_118 = arith.constant 0 : index
    %133 = vector.load %arg25[%c0_115, %c1_116, %c1_117, %c0_118] : memref<1x10x10x48xf32, #tpu.memory_space<vmem>>, vector<1x8x8x48xf32>
    tpu.vector_store %arg25[%c0_115, %c1_116, %c1_117, %c0_118], %132 {strides = array<i32>} : memref<1x10x10x48xf32, #tpu.memory_space<vmem>>, vector<1x8x8x48xf32>,
    %c0_119 = arith.constant 0 : index
    %c0_120 = arith.constant 0 : index
    %134 = vector.load %arg12[%c0_119, %c0_120] : memref<9x48xf32, #tpu.memory_space<vmem>>, vector<9x48xf32>
    %c0_121 = arith.constant 0 : index
    %c0_122 = arith.constant 0 : index
    %c0_123 = arith.constant 0 : index
    %c0_124 = arith.constant 0 : index
    %135 = vector.load %arg25[%c0_121, %c0_122, %c0_123, %c0_124] : memref<1x10x10x48xf32, #tpu.memory_space<vmem>>, vector<1x8x8x48xf32>
    %136 = vector.extract_strided_slice %134 {offsets = [0, 0], sizes = [1, 48], strides = [1, 1]} : vector<9x48xf32> to vector<1x48xf32>
    %137 = vector.shape_cast %136 : vector<1x48xf32> to vector<48xf32>
    %138 = vector.shape_cast %137 : vector<48xf32> to vector<1x1x1x48xf32>
    %139 = vector.broadcast %138 : vector<1x1x1x48xf32> to vector<1x8x8x48xf32>
    %140 = arith.mulf %135, %139 : vector<1x8x8x48xf32>
    %c0_125 = arith.constant 0 : index
    %c0_126 = arith.constant 0 : index
    %c1_127 = arith.constant 1 : index
    %c0_128 = arith.constant 0 : index
    %141 = vector.load %arg25[%c0_125, %c0_126, %c1_127, %c0_128] : memref<1x10x10x48xf32, #tpu.memory_space<vmem>>, vector<1x8x8x48xf32>
    %142 = vector.extract_strided_slice %134 {offsets = [1, 0], sizes = [1, 48], strides = [1, 1]} : vector<9x48xf32> to vector<1x48xf32>
    %143 = vector.shape_cast %142 : vector<1x48xf32> to vector<48xf32>
    %144 = vector.shape_cast %143 : vector<48xf32> to vector<1x1x1x48xf32>
    %145 = vector.broadcast %144 : vector<1x1x1x48xf32> to vector<1x8x8x48xf32>
    %146 = arith.mulf %141, %145 : vector<1x8x8x48xf32>
    %147 = arith.addf %140, %146 : vector<1x8x8x48xf32>
    %c0_129 = arith.constant 0 : index
    %c0_130 = arith.constant 0 : index
    %c2 = arith.constant 2 : index
    %c0_131 = arith.constant 0 : index
    %148 = vector.load %arg25[%c0_129, %c0_130, %c2, %c0_131] : memref<1x10x10x48xf32, #tpu.memory_space<vmem>>, vector<1x8x8x48xf32>
    %149 = vector.extract_strided_slice %134 {offsets = [2, 0], sizes = [1, 48], strides = [1, 1]} : vector<9x48xf32> to vector<1x48xf32>
    %150 = vector.shape_cast %149 : vector<1x48xf32> to vector<48xf32>
    %151 = vector.shape_cast %150 : vector<48xf32> to vector<1x1x1x48xf32>
    %152 = vector.broadcast %151 : vector<1x1x1x48xf32> to vector<1x8x8x48xf32>
    %153 = arith.mulf %148, %152 : vector<1x8x8x48xf32>
    %154 = arith.addf %147, %153 : vector<1x8x8x48xf32>
    %c0_132 = arith.constant 0 : index
    %c1_133 = arith.constant 1 : index
    %c0_134 = arith.constant 0 : index
    %c0_135 = arith.constant 0 : index
    %155 = vector.load %arg25[%c0_132, %c1_133, %c0_134, %c0_135] : memref<1x10x10x48xf32, #tpu.memory_space<vmem>>, vector<1x8x8x48xf32>
    %156 = vector.extract_strided_slice %134 {offsets = [3, 0], sizes = [1, 48], strides = [1, 1]} : vector<9x48xf32> to vector<1x48xf32>
    %157 = vector.shape_cast %156 : vector<1x48xf32> to vector<48xf32>
    %158 = vector.shape_cast %157 : vector<48xf32> to vector<1x1x1x48xf32>
    %159 = vector.broadcast %158 : vector<1x1x1x48xf32> to vector<1x8x8x48xf32>
    %160 = arith.mulf %155, %159 : vector<1x8x8x48xf32>
    %161 = arith.addf %154, %160 : vector<1x8x8x48xf32>
    %c0_136 = arith.constant 0 : index
    %c1_137 = arith.constant 1 : index
    %c1_138 = arith.constant 1 : index
    %c0_139 = arith.constant 0 : index
    %162 = vector.load %arg25[%c0_136, %c1_137, %c1_138, %c0_139] : memref<1x10x10x48xf32, #tpu.memory_space<vmem>>, vector<1x8x8x48xf32>
    %163 = vector.extract_strided_slice %134 {offsets = [4, 0], sizes = [1, 48], strides = [1, 1]} : vector<9x48xf32> to vector<1x48xf32>
    %164 = vector.shape_cast %163 : vector<1x48xf32> to vector<48xf32>
    %165 = vector.shape_cast %164 : vector<48xf32> to vector<1x1x1x48xf32>
    %166 = vector.broadcast %165 : vector<1x1x1x48xf32> to vector<1x8x8x48xf32>
    %167 = arith.mulf %162, %166 : vector<1x8x8x48xf32>
    %168 = arith.addf %161, %167 : vector<1x8x8x48xf32>
    %c0_140 = arith.constant 0 : index
    %c1_141 = arith.constant 1 : index
    %c2_142 = arith.constant 2 : index
    %c0_143 = arith.constant 0 : index
    %169 = vector.load %arg25[%c0_140, %c1_141, %c2_142, %c0_143] : memref<1x10x10x48xf32, #tpu.memory_space<vmem>>, vector<1x8x8x48xf32>
    %170 = vector.extract_strided_slice %134 {offsets = [5, 0], sizes = [1, 48], strides = [1, 1]} : vector<9x48xf32> to vector<1x48xf32>
    %171 = vector.shape_cast %170 : vector<1x48xf32> to vector<48xf32>
    %172 = vector.shape_cast %171 : vector<48xf32> to vector<1x1x1x48xf32>
    %173 = vector.broadcast %172 : vector<1x1x1x48xf32> to vector<1x8x8x48xf32>
    %174 = arith.mulf %169, %173 : vector<1x8x8x48xf32>
    %175 = arith.addf %168, %174 : vector<1x8x8x48xf32>
    %c0_144 = arith.constant 0 : index
    %c2_145 = arith.constant 2 : index
    %c0_146 = arith.constant 0 : index
    %c0_147 = arith.constant 0 : index
    %176 = vector.load %arg25[%c0_144, %c2_145, %c0_146, %c0_147] : memref<1x10x10x48xf32, #tpu.memory_space<vmem>>, vector<1x8x8x48xf32>
    %177 = vector.extract_strided_slice %134 {offsets = [6, 0], sizes = [1, 48], strides = [1, 1]} : vector<9x48xf32> to vector<1x48xf32>
    %178 = vector.shape_cast %177 : vector<1x48xf32> to vector<48xf32>
    %179 = vector.shape_cast %178 : vector<48xf32> to vector<1x1x1x48xf32>
    %180 = vector.broadcast %179 : vector<1x1x1x48xf32> to vector<1x8x8x48xf32>
    %181 = arith.mulf %176, %180 : vector<1x8x8x48xf32>
    %182 = arith.addf %175, %181 : vector<1x8x8x48xf32>
    %c0_148 = arith.constant 0 : index
    %c2_149 = arith.constant 2 : index
    %c1_150 = arith.constant 1 : index
    %c0_151 = arith.constant 0 : index
    %183 = vector.load %arg25[%c0_148, %c2_149, %c1_150, %c0_151] : memref<1x10x10x48xf32, #tpu.memory_space<vmem>>, vector<1x8x8x48xf32>
    %184 = vector.extract_strided_slice %134 {offsets = [7, 0], sizes = [1, 48], strides = [1, 1]} : vector<9x48xf32> to vector<1x48xf32>
    %185 = vector.shape_cast %184 : vector<1x48xf32> to vector<48xf32>
    %186 = vector.shape_cast %185 : vector<48xf32> to vector<1x1x1x48xf32>
    %187 = vector.broadcast %186 : vector<1x1x1x48xf32> to vector<1x8x8x48xf32>
    %188 = arith.mulf %183, %187 : vector<1x8x8x48xf32>
    %189 = arith.addf %182, %188 : vector<1x8x8x48xf32>
    %c0_152 = arith.constant 0 : index
    %c2_153 = arith.constant 2 : index
    %c2_154 = arith.constant 2 : index
    %c0_155 = arith.constant 0 : index
    %190 = vector.load %arg25[%c0_152, %c2_153, %c2_154, %c0_155] : memref<1x10x10x48xf32, #tpu.memory_space<vmem>>, vector<1x8x8x48xf32>
    %191 = vector.extract_strided_slice %134 {offsets = [8, 0], sizes = [1, 48], strides = [1, 1]} : vector<9x48xf32> to vector<1x48xf32>
    %192 = vector.shape_cast %191 : vector<1x48xf32> to vector<48xf32>
    %193 = vector.shape_cast %192 : vector<48xf32> to vector<1x1x1x48xf32>
    %194 = vector.broadcast %193 : vector<1x1x1x48xf32> to vector<1x8x8x48xf32>
    %195 = arith.mulf %190, %194 : vector<1x8x8x48xf32>
    %196 = arith.addf %189, %195 : vector<1x8x8x48xf32>
    %c0_156 = arith.constant 0 : index
    %c0_157 = arith.constant 0 : index
    %197 = vector.load %arg13[%c0_156, %c0_157] : memref<1x48xf32, #tpu.memory_space<vmem>>, vector<1x48xf32>
    %198 = vector.shape_cast %197 : vector<1x48xf32> to vector<48xf32>
    %199 = vector.shape_cast %198 : vector<48xf32> to vector<1x1x1x48xf32>
    %200 = vector.broadcast %199 : vector<1x1x1x48xf32> to vector<1x8x8x48xf32>
    %201 = arith.addf %196, %200 : vector<1x8x8x48xf32>
    %cst_158 = arith.constant 0.000000e+00 : f32
    %202 = vector.broadcast %cst_158 : f32 to vector<1x8x8x48xf32>
    %203 = arith.maximumf %201, %202 : vector<1x8x8x48xf32>
    %204 = vector.shape_cast %203 : vector<1x8x8x48xf32> to vector<64x48xf32>
    %c0_159 = arith.constant 0 : index
    %c0_160 = arith.constant 0 : index
    %205 = vector.load %arg14[%c0_159, %c0_160] : memref<48x32xf32, #tpu.memory_space<vmem>>, vector<48x32xf32>
    %cst_161 = arith.constant dense<0.000000e+00> : vector<64x32xf32>
    %206 = tpu.matmul %204, %205, %cst_161 {dimension_numbers = #tpu.dot_dimension_numbers<[1], [0], [0], [1], [0, 0, 1, 1], [], []>} : vector<64x48xf32>, vector<48x32xf32>, vector<64x32xf32> -> vector<64x32xf32>
    %c0_162 = arith.constant 0 : index
    %c0_163 = arith.constant 0 : index
    %207 = vector.load %arg15[%c0_162, %c0_163] : memref<1x32xf32, #tpu.memory_space<vmem>>, vector<1x32xf32>
    %208 = vector.shape_cast %207 : vector<1x32xf32> to vector<32xf32>
    %209 = vector.shape_cast %208 : vector<32xf32> to vector<1x32xf32>
    %210 = vector.broadcast %209 : vector<1x32xf32> to vector<64x32xf32>
    %211 = arith.addf %206, %210 : vector<64x32xf32>
    %c0_164 = arith.constant 0 : index
    %c0_165 = arith.constant 0 : index
    %212 = vector.load %arg16[%c0_164, %c0_165] : memref<32x64xf32, #tpu.memory_space<vmem>>, vector<32x64xf32>
    %cst_166 = arith.constant dense<0.000000e+00> : vector<64x64xf32>
    %213 = tpu.matmul %211, %212, %cst_166 {dimension_numbers = #tpu.dot_dimension_numbers<[1], [0], [0], [1], [0, 0, 1, 1], [], []>} : vector<64x32xf32>, vector<32x64xf32>, vector<64x64xf32> -> vector<64x64xf32>
    %c0_167 = arith.constant 0 : index
    %c0_168 = arith.constant 0 : index
    %214 = vector.load %arg17[%c0_167, %c0_168] : memref<1x64xf32, #tpu.memory_space<vmem>>, vector<1x64xf32>
    %215 = vector.shape_cast %214 : vector<1x64xf32> to vector<64xf32>
    %216 = vector.shape_cast %215 : vector<64xf32> to vector<1x64xf32>
    %217 = vector.broadcast %216 : vector<1x64xf32> to vector<64x64xf32>
    %218 = arith.addf %213, %217 : vector<64x64xf32>
    %cst_169 = arith.constant 0.000000e+00 : f32
    %219 = vector.broadcast %cst_169 : f32 to vector<64x64xf32>
    %220 = arith.maximumf %218, %219 : vector<64x64xf32>
    %221 = vector.shape_cast %220 : vector<64x64xf32> to vector<1x64x64xf32>
    %cst_170 = arith.constant dense<0.000000e+00> : vector<1x64xf32>
    %222 = vector.multi_reduction <add>, %221, %cst_170 [1] : vector<1x64x64xf32> to vector<1x64xf32>
    %cst_171 = arith.constant 6.400000e+01 : f32
    %223 = vector.broadcast %cst_171 : f32 to vector<1x64xf32>
    %224 = arith.divf %222, %223 : vector<1x64xf32>
    %c0_172 = arith.constant 0 : index
    %c0_173 = arith.constant 0 : index
    %225 = vector.load %arg18[%c0_172, %c0_173] : memref<64x384xf32, #tpu.memory_space<vmem>>, vector<64x384xf32>
    %cst_174 = arith.constant dense<0.000000e+00> : vector<1x384xf32>
    %226 = tpu.matmul %224, %225, %cst_174 {dimension_numbers = #tpu.dot_dimension_numbers<[1], [0], [0], [1], [0, 0, 1, 1], [], []>} : vector<1x64xf32>, vector<64x384xf32>, vector<1x384xf32> -> vector<1x384xf32>
    %c0_175 = arith.constant 0 : index
    %c0_176 = arith.constant 0 : index
    %227 = vector.load %arg19[%c0_175, %c0_176] : memref<1x384xf32, #tpu.memory_space<vmem>>, vector<1x384xf32>
    %228 = vector.shape_cast %227 : vector<1x384xf32> to vector<384xf32>
    %229 = vector.shape_cast %228 : vector<384xf32> to vector<1x384xf32>
    %230 = arith.addf %226, %229 : vector<1x384xf32>
    %231 = vector.shape_cast %230 : vector<1x384xf32> to vector<1x1x384xf32>
    %c0_177 = arith.constant 0 : index
    %c0_178 = arith.constant 0 : index
    %c0_179 = arith.constant 0 : index
    %232 = vector.load %arg20[%c0_177, %c0_178, %c0_179] : memref<1x1x384xf32, #tpu.memory_space<vmem>>, vector<1x1x384xf32>
    tpu.vector_store %arg20[%c0_177, %c0_178, %c0_179], %231 {strides = array<i32>} : memref<1x1x384xf32, #tpu.memory_space<vmem>>, vector<1x1x384xf32>,
    return
  }
  func.func @transform_0(%arg0: i32) -> (i32, i32, i32) {
    %c0_i32 = arith.constant 0 : i32
    %c0_i32_0 = arith.constant 0 : i32
    %c0_i32_1 = arith.constant 0 : i32
    return %arg0, %c0_i32, %c0_i32_0 : i32, i32, i32
  }
  func.func @transform_1(%arg0: i32) -> (i32, i32) {
    %c0_i32 = arith.constant 0 : i32
    %c0_i32_0 = arith.constant 0 : i32
    %c0_i32_1 = arith.constant 0 : i32
    return %c0_i32, %c0_i32_0 : i32, i32
  }
  func.func @transform_2(%arg0: i32) -> (i32, i32) {
    %c0_i32 = arith.constant 0 : i32
    %c0_i32_0 = arith.constant 0 : i32
    %c0_i32_1 = arith.constant 0 : i32
    return %c0_i32, %c0_i32_0 : i32, i32
  }
  func.func @transform_3(%arg0: i32) -> (i32, i32) {
    %c0_i32 = arith.constant 0 : i32
    %c0_i32_0 = arith.constant 0 : i32
    %c0_i32_1 = arith.constant 0 : i32
    return %c0_i32, %c0_i32_0 : i32, i32
  }
  func.func @transform_4(%arg0: i32) -> (i32, i32) {
    %c0_i32 = arith.constant 0 : i32
    %c0_i32_0 = arith.constant 0 : i32
    %c0_i32_1 = arith.constant 0 : i32
    return %c0_i32, %c0_i32_0 : i32, i32
  }
  func.func @transform_5(%arg0: i32) -> (i32, i32) {
    %c0_i32 = arith.constant 0 : i32
    %c0_i32_0 = arith.constant 0 : i32
    %c0_i32_1 = arith.constant 0 : i32
    return %c0_i32, %c0_i32_0 : i32, i32
  }
  func.func @transform_6(%arg0: i32) -> (i32, i32) {
    %c0_i32 = arith.constant 0 : i32
    %c0_i32_0 = arith.constant 0 : i32
    %c0_i32_1 = arith.constant 0 : i32
    return %c0_i32, %c0_i32_0 : i32, i32
  }
  func.func @transform_7(%arg0: i32) -> (i32, i32) {
    %c0_i32 = arith.constant 0 : i32
    %c0_i32_0 = arith.constant 0 : i32
    %c0_i32_1 = arith.constant 0 : i32
    return %c0_i32, %c0_i32_0 : i32, i32
  }
  func.func @transform_8(%arg0: i32) -> (i32, i32) {
    %c0_i32 = arith.constant 0 : i32
    %c0_i32_0 = arith.constant 0 : i32
    %c0_i32_1 = arith.constant 0 : i32
    return %c0_i32, %c0_i32_0 : i32, i32
  }
  func.func @transform_9(%arg0: i32) -> (i32, i32) {
    %c0_i32 = arith.constant 0 : i32
    %c0_i32_0 = arith.constant 0 : i32
    %c0_i32_1 = arith.constant 0 : i32
    return %c0_i32, %c0_i32_0 : i32, i32
  }
  func.func @transform_10(%arg0: i32) -> (i32, i32) {
    %c0_i32 = arith.constant 0 : i32
    %c0_i32_0 = arith.constant 0 : i32
    %c0_i32_1 = arith.constant 0 : i32
    return %c0_i32, %c0_i32_0 : i32, i32
  }
  func.func @transform_11(%arg0: i32) -> (i32, i32) {
    %c0_i32 = arith.constant 0 : i32
    %c0_i32_0 = arith.constant 0 : i32
    %c0_i32_1 = arith.constant 0 : i32
    return %c0_i32, %c0_i32_0 : i32, i32
  }
  func.func @transform_12(%arg0: i32) -> (i32, i32) {
    %c0_i32 = arith.constant 0 : i32
    %c0_i32_0 = arith.constant 0 : i32
    %c0_i32_1 = arith.constant 0 : i32
    return %c0_i32, %c0_i32_0 : i32, i32
  }
  func.func @transform_13(%arg0: i32) -> (i32, i32) {
    %c0_i32 = arith.constant 0 : i32
    %c0_i32_0 = arith.constant 0 : i32
    %c0_i32_1 = arith.constant 0 : i32
    return %c0_i32, %c0_i32_0 : i32, i32
  }
  func.func @transform_14(%arg0: i32) -> (i32, i32) {
    %c0_i32 = arith.constant 0 : i32
    %c0_i32_0 = arith.constant 0 : i32
    %c0_i32_1 = arith.constant 0 : i32
    return %c0_i32, %c0_i32_0 : i32, i32
  }
  func.func @transform_15(%arg0: i32) -> (i32, i32) {
    %c0_i32 = arith.constant 0 : i32
    %c0_i32_0 = arith.constant 0 : i32
    %c0_i32_1 = arith.constant 0 : i32
    return %c0_i32, %c0_i32_0 : i32, i32
  }
  func.func @transform_16(%arg0: i32) -> (i32, i32) {
    %c0_i32 = arith.constant 0 : i32
    %c0_i32_0 = arith.constant 0 : i32
    %c0_i32_1 = arith.constant 0 : i32
    return %c0_i32, %c0_i32_0 : i32, i32
  }
  func.func @transform_17(%arg0: i32) -> (i32, i32) {
    %c0_i32 = arith.constant 0 : i32
    %c0_i32_0 = arith.constant 0 : i32
    %c0_i32_1 = arith.constant 0 : i32
    return %c0_i32, %c0_i32_0 : i32, i32
  }
  func.func @transform_18(%arg0: i32) -> (i32, i32) {
    %c0_i32 = arith.constant 0 : i32
    %c0_i32_0 = arith.constant 0 : i32
    %c0_i32_1 = arith.constant 0 : i32
    return %c0_i32, %c0_i32_0 : i32, i32
  }
  func.func @transform_19(%arg0: i32) -> (i32, i32, i32) {
    %c0_i32 = arith.constant 0 : i32
    %c0_i32_0 = arith.constant 0 : i32
    %c0_i32_1 = arith.constant 0 : i32
    return %arg0, %c0_i32, %c0_i32_0 : i32, i32, i32
  }
}

</mosaic_0001>

<bundles_post_ra>
// kernel: shape_encoder_forward.1
= control target key start
LH: loop header
LB: loop body
LE: loop exit
PB: predicated region body
PF: predicated region fallthrough
CT: control target
= control target key end

     0   :  { %s4336_s0 = inlined_call_operand.vmem [shape: f32[2,256,27], index: 0, kind: input, shape index: {}]   ;;  %s4337_s1 = inlined_call_operand.vmem [shape: f32[27,16], index: 1, kind: input, shape index: {}]   ;;  %s4338_s2 = inlined_call_operand.vmem [shape: f32[1,16], index: 2, kind: input, shape index: {}]   ;;  %s4339_s3 = inlined_call_operand.vmem [shape: f32[16,32], index: 3, kind: input, shape index: {}]   ;;  %s4340_s4 = inlined_call_operand.vmem [shape: f32[1,32], index: 4, kind: input, shape index: {}]   ;;  %s4341_s5 = inlined_call_operand.vmem [shape: f32[9,32], index: 5, kind: input, shape index: {}]   ;;  %s4342_s6 = inlined_call_operand.vmem [shape: f32[1,32], index: 6, kind: input, shape index: {}]   ;;  %s4343_s7 = inlined_call_operand.vmem [shape: f32[32,24], index: 7, kind: input, shape index: {}]   ;;  %s4344_s8 = inlined_call_operand.vmem [shape: f32[1,24], index: 8, kind: input, shape index: {}]   ;;  %s4345_s9 = inlined_call_operand.vmem [shape: f32[24,48], index: 9, kind: input, shape index: {}]   ;;  %s4346_s10 = inlined_call_operand.vmem [shape: f32[1,48], index: 10, kind: input, shape index: {}]   ;;  %s4347_s11 = inlined_call_operand.vmem [shape: f32[9,48], index: 11, kind: input, shape index: {}]   ;;  %s4348_s12 = inlined_call_operand.vmem [shape: f32[1,48], index: 12, kind: input, shape index: {}]   ;;  %s4349_s13 = inlined_call_operand.vmem [shape: f32[48,32], index: 13, kind: input, shape index: {}]   ;;  %s4350_s14 = inlined_call_operand.vmem [shape: f32[1,32], index: 14, kind: input, shape index: {}]   ;;  %s4351_s15 = inlined_call_operand.vmem [shape: f32[32,64], index: 15, kind: input, shape index: {}]   ;;  %s4352_s16 = inlined_call_operand.vmem [shape: f32[1,64], index: 16, kind: input, shape index: {}]   ;;  %s4353_s17 = inlined_call_operand.vmem [shape: f32[64,384], index: 17, kind: input, shape index: {}]   ;;  %s4354_s18 = inlined_call_operand.vmem [shape: f32[1,384], index: 18, kind: input, shape index: {}]   ;;  %s4355_s19 = inlined_call_operand.vmem [shape: f32[2,1,384], index: 19, kind: output, shape index: {}]  }
   0x1   :  { %4374 = sst [smem:[#allocation11_spill]] %s4336_s0  ;;  %s3452_s0 = smov 0  }
   0x2   :  { %4375 = sst [smem:[#allocation12_spill]] %s4337_s1 }
   0x3   :  { %4376 = sst [smem:[#allocation13_spill]] %s4338_s2 }
   0x4   :  { %4377 = sst [smem:[#allocation14_spill]] %s4339_s3 }
   0x5 LB: > { %s2873_s30 = sadd.s32 4294967295, %s3347_s0   ;;  %p2877_p0 = scmp.ge.s32.totalorder %s3347_s0, 1  ;;  %s3347_s0 = sphi %s3452_s0, %s29_s0  }
   0x6   : > { %p537_p1 = scmp.lt.s32.totalorder %s3347_s0, 3 }
   0x8   : > { %p538_p2 = pnand %p2877_p0, %p537_p1 }
   0xa   : > { %541 = sbr.rel (%p538_p2) target bundleno = 1581 (0x62d), region = 96 }
   0xf   : > { %s4378_s1 = sld [smem:[#allocation12_spill]]  ;;  %vm741_vm0 = vcmask 1042432   ;;  %p592_p3 = scmp.lt.s32.totalorder %s2873_s30, 1  ;;  %vm644_vm1 = vcmask 220160   ;;  %vm1011_vm2 = vcmask 130048   ;;  %vm1366_vm3 = vcmask 261120  }
  0x10   : > { %s4379_s29 = sld [smem:[#allocation11_spill]]  ;;  %vm1375_vm4 = vcmask 253952   ;;  %vm1844_vm5 = vcmask 195584   ;;  %vm1982_vm6 = vcmask 392192   ;;  %vm1989_vm7 = vcmask 385024  }
  0x11   : > { %s4398_s30 = smov (!%p592_p3, %s2873_s30), 1  ;;  %s4380_s2 = sld [smem:[#allocation14_spill]]  ;;  %vm1984_vm8 = vcmask 386048   ;;  %vm3350_vm9 = vmmov 0   ;;  %vm2579_vm10 = vcmask 523264  }
  0x12   : > { %s2991_s26 = sshll.u32 %s4398_s30, 8  ;;  %s3329_s24 = smul.u32 3, %s4398_s30 }
  0x15   : > { %v636_v0 = vld [vmem:[%s4378_s1 + $0x18] sm:$0x7]  ;;  %v635_v1 = vld [vmem:[%s4378_s1 + $0x10] sm:$0xff]  ;;  %v634_v2 = vld [vmem:[%s4378_s1 + $0x8] sm:$0xff] }
  0x16   : > { %3120 = vmatprep.subr.msk.mxu0 %vm741_vm0, %v636_v0  ;;  %v633_v3 = vld [vmem:[%s4378_s1] sm:$0xff]  ;;  %s3478_s20 = scalar_lea.vmem %s4379_s29, %s2991_s26  ;;  %s4381_s26 = sld [smem:[#allocation13_spill]] }
  0x17   : > { %3121 = vmatpush3.msk.msra.mxu0 %vm741_vm0, %v636_v0  ;;  %v601_v4 = vld [vmem:[%s3478_s20] sm:$0xff]  ;;  %v602_v5 = vld [vmem:[%s3478_s20 + $0x8] sm:$0xff]  ;;  %v603_v6 = vld [vmem:[%s3478_s20 + $0x10] sm:$0xff] }
  0x18   : > { %3122 = vmatprep.subr.mxu0 %v635_v1  ;;  %3128 = vmatprep.mubr.msk.f32.mxu0 %vm644_vm1, %v601_v4  ;;  %v604_v7 = vld [vmem:[%s3478_s20 + $0x18] sm:$0xff]  ;;  %v605_v8 = vld [vmem:[%s3478_s20 + $0x20] sm:$0xff]  ;;  %v606_v9 = vld [vmem:[%s3478_s20 + $0x28] sm:$0xff] }
  0x19   : > { %3123 = vmatpush3.msra.mxu0 %v635_v1  ;;  %v607_v10 = vld [vmem:[%s3478_s20 + $0x30] sm:$0xff]  ;;  %v608_v11 = vld [vmem:[%s3478_s20 + $0x38] sm:$0xff]  ;;  %v609_v12 = vld [vmem:[%s3478_s20 + $0x40] sm:$0xff] }
  0x1a   : > { %3124 = vmatprep.subr.mxu0 %v634_v2  ;;  %v610_v13 = vld [vmem:[%s3478_s20 + $0x48] sm:$0xff]  ;;  %v611_v14 = vld [vmem:[%s3478_s20 + $0x50] sm:$0xff]  ;;  %v612_v15 = vld [vmem:[%s3478_s20 + $0x58] sm:$0xff] }
  0x1b   : > { %3125 = vmatpush3.msra.mxu0 %v634_v2  ;;  %v613_v16 = vld [vmem:[%s3478_s20 + $0x60] sm:$0xff]  ;;  %v614_v17 = vld [vmem:[%s3478_s20 + $0x68] sm:$0xff]  ;;  %v615_v18 = vld [vmem:[%s3478_s20 + $0x70] sm:$0xff] }
  0x1c   : > { %3126 = vmatprep.subr.mxu0 %v633_v3  ;;  %v616_v19 = vld [vmem:[%s3478_s20 + $0x78] sm:$0xff]  ;;  %v617_v20 = vld [vmem:[%s3478_s20 + $0x80] sm:$0xff]  ;;  %v618_v21 = vld [vmem:[%s3478_s20 + $0x88] sm:$0xff] }
  0x1d   : > { %3127 = vmatpush3.msra.mxu0 %v633_v3  ;;  %v619_v22 = vld [vmem:[%s3478_s20 + $0x90] sm:$0xff]  ;;  %v620_v23 = vld [vmem:[%s3478_s20 + $0x98] sm:$0xff]  ;;  %v621_v24 = vld [vmem:[%s3478_s20 + $0xa0] sm:$0xff] }
  0x1e   : > { %3129 = vmatmul.mubr.msk.f32.vlgmr.msra.gmra.mxu0 %vm644_vm1, %v602_v5  ;;  %v622_v25 = vld [vmem:[%s3478_s20 + $0xa8] sm:$0xff]  ;;  %v623_v26 = vld [vmem:[%s3478_s20 + $0xb0] sm:$0xff]  ;;  %v624_v27 = vld [vmem:[%s3478_s20 + $0xb8] sm:$0xff] }
  0x1f   : > { %3131 = vmatprep.mubr.msk.f32.mxu0 %vm644_vm1, %v603_v6  ;;  %v625_v28 = vld [vmem:[%s3478_s20 + $0xc0] sm:$0xff]  ;;  %v626_v29 = vld [vmem:[%s3478_s20 + $0xc8] sm:$0xff]  ;;  %v627_v30 = vld [vmem:[%s3478_s20 + $0xd0] sm:$0xff] }
  0x20   : > { %v628_v31 = vld [vmem:[%s3478_s20 + $0xd8] sm:$0xff]  ;;  %v629_v32 = vld [vmem:[%s3478_s20 + $0xe0] sm:$0xff]  ;;  %v630_v33 = vld [vmem:[%s3478_s20 + $0xe8] sm:$0xff] }
  0x21   : > { %v631_v34 = vld [vmem:[%s3478_s20 + $0xf0] sm:$0xff]  ;;  %v632_v35 = vld [vmem:[%s3478_s20 + $0xf8] sm:$0xff]  ;;  %v1003_v36 = vld [vmem:[%s4380_s2 + $0x8] sm:$0xff] }
  0x22   : > { %3132 = vmatmul.mubr.msk.f32.gmra.mxu0 %vm644_vm1, %v604_v7  ;;  %3176 = vmatprep.subr.mxu1 %v1003_v36  ;;  %v1002_v37 = vld [vmem:[%s4380_s2] sm:$0xff] }
  0x23   : > { %3134 = vmatprep.mubr.msk.f32.mxu0 %vm644_vm1, %v605_v8  ;;  %3177 = vmatpush3.msra.mxu1 %v1003_v36  ;;  %v3553_v38 = vld [vmem:[%s4381_s26] ss:$0 sm:$0xff]  ;;  %s600_s26 = scalar_lea.vmem %s4355_s19, %s3329_s24 }
  0x24   : > { %3178 = vmatprep.subr.mxu1 %v1002_v37 }
  0x25   : > { %3179 = vmatpush3.msra.mxu1 %v1002_v37 }
  0x26   : > { %3135 = vmatmul.mubr.msk.f32.gmra.mxu0 %vm644_vm1, %v606_v9 }
  0x27   : > { %3137 = vmatprep.mubr.msk.f32.mxu0 %vm644_vm1, %v607_v10 }
  0x2a   : > { %3138 = vmatmul.mubr.msk.f32.gmra.mxu0 %vm644_vm1, %v608_v11 }
  0x2b   : > { %3140 = vmatprep.mubr.msk.f32.mxu0 %vm644_vm1, %v609_v12 }
  0x2e   : > { %3141 = vmatmul.mubr.msk.f32.gmra.mxu0 %vm644_vm1, %v610_v13 }
  0x2f   : > { %3143 = vmatprep.mubr.msk.f32.mxu0 %vm644_vm1, %v611_v14 }
  0x32   : > { %3144 = vmatmul.mubr.msk.f32.gmra.mxu0 %vm644_vm1, %v612_v15 }
  0x33   : > { %3146 = vmatprep.mubr.msk.f32.mxu0 %vm644_vm1, %v613_v16 }
  0x36   : > { %3147 = vmatmul.mubr.msk.f32.gmra.mxu0 %vm644_vm1, %v614_v17 }
  0x37   : > { %3149 = vmatprep.mubr.msk.f32.mxu0 %vm644_vm1, %v615_v18 }
  0x3a   : > { %3150 = vmatmul.mubr.msk.f32.gmra.mxu0 %vm644_vm1, %v616_v19 }
  0x3b   : > { %3152 = vmatprep.mubr.msk.f32.mxu0 %vm644_vm1, %v617_v20 }
  0x3e   : > { %3153 = vmatmul.mubr.msk.f32.gmra.mxu0 %vm644_vm1, %v618_v21 }
  0x3f   : > { %3155 = vmatprep.mubr.msk.f32.mxu0 %vm644_vm1, %v619_v22 }
  0x42   : > { %3156 = vmatmul.mubr.msk.f32.gmra.mxu0 %vm644_vm1, %v620_v23 }
  0x43   : > { %3158 = vmatprep.mubr.msk.f32.mxu0 %vm644_vm1, %v621_v24 }
  0x46   : > { %3159 = vmatmul.mubr.msk.f32.gmra.mxu0 %vm644_vm1, %v622_v25 }
  0x47   : > { %3161 = vmatprep.mubr.msk.f32.mxu0 %vm644_vm1, %v623_v26 }
  0x4a   : > { %3162 = vmatmul.mubr.msk.f32.gmra.mxu0 %vm644_vm1, %v624_v27 }
  0x4b   : > { %3164 = vmatprep.mubr.msk.f32.mxu0 %vm644_vm1, %v625_v28 }
  0x4e   : > { %3165 = vmatmul.mubr.msk.f32.gmra.mxu0 %vm644_vm1, %v626_v29 }
  0x4f   : > { %3167 = vmatprep.mubr.msk.f32.mxu0 %vm644_vm1, %v627_v30 }
  0x52   : > { %3168 = vmatmul.mubr.msk.f32.gmra.mxu0 %vm644_vm1, %v628_v31 }
  0x53   : > { %3170 = vmatprep.mubr.msk.f32.mxu0 %vm644_vm1, %v629_v32 }
  0x56   : > { %3171 = vmatmul.mubr.msk.f32.gmra.mxu0 %vm644_vm1, %v630_v33 }
  0x57   : > { %3173 = vmatprep.mubr.msk.f32.mxu0 %vm644_vm1, %v631_v34 }
  0x5a   : > { %3174 = vmatmul.mubr.msk.f32.gmra.mxu0 %vm644_vm1, %v632_v35 }
  0xde   : > { %v3130_v39 = vpop.f32.mrf.mxu0 }
  0xdf   : > { %v817_v40 = vadd.f32 %v3130_v39, %v3553_v38 }
  0xe0   : > { %v811_v41 = vpop.f32.mrf.mxu0 }
  0xe1   : > { %v812_v42 = vadd.f32 %v3553_v38, %v811_v41  ;;  %v971_v45 = vmax.f32 %v817_v40, 0.0 }
  0xe2   : > { %v3133_v43 = vpop.f32.mrf.mxu0 }
  0xe3   : > { %v970_v44 = vmax.f32 %v812_v42, 0.0  ;;  %v827_v46 = vadd.f32 %v3133_v43, %v3553_v38 }
  0xe4   : > { %v821_v47 = vpop.f32.mrf.mxu0 }
  0xe5   : > { %v822_v48 = vadd.f32 %v3553_v38, %v821_v47  ;;  %3180 = vmatprep.mubr.msk.f32.mxu1 %vm1011_vm2, %v970_v44  ;;  %v973_v51 = vmax.f32 %v827_v46, 0.0 }
  0xe6   : > { %v3136_v49 = vpop.f32.mrf.mxu0  ;;  %3181 = vmatmul.mubr.msk.f32.vlgmr.msra.gmra.mxu1 %vm1011_vm2, %v971_v45 }
  0xe7   : > { %v972_v50 = vmax.f32 %v822_v48, 0.0  ;;  %v837_v52 = vadd.f32 %v3136_v49, %v3553_v38 }
  0xe8   : > { %v831_v53 = vpop.f32.mrf.mxu0 }
  0xe9   : > { %v832_v54 = vadd.f32 %v3553_v38, %v831_v53  ;;  %3183 = vmatprep.mubr.msk.f32.mxu1 %vm1011_vm2, %v972_v50  ;;  %v975_v57 = vmax.f32 %v837_v52, 0.0 }
  0xea   : > { %v3139_v55 = vpop.f32.mrf.mxu0  ;;  %3184 = vmatmul.mubr.msk.f32.gmra.mxu1 %vm1011_vm2, %v973_v51 }
  0xeb   : > { %v974_v56 = vmax.f32 %v832_v54, 0.0  ;;  %v847_v58 = vadd.f32 %v3139_v55, %v3553_v38 }
  0xec   : > { %v841_v59 = vpop.f32.mrf.mxu0 }
  0xed   : > { %v842_v60 = vadd.f32 %v3553_v38, %v841_v59  ;;  %3186 = vmatprep.mubr.msk.f32.mxu1 %vm1011_vm2, %v974_v56  ;;  %v977_v63 = vmax.f32 %v847_v58, 0.0 }
  0xee   : > { %v3142_v61 = vpop.f32.mrf.mxu0  ;;  %3187 = vmatmul.mubr.msk.f32.gmra.mxu1 %vm1011_vm2, %v975_v57 }
  0xef   : > { %v976_v62 = vmax.f32 %v842_v60, 0.0  ;;  %v857_v0 = vadd.f32 %v3142_v61, %v3553_v38 }
  0xf0   : > { %v851_v1 = vpop.f32.mrf.mxu0 }
  0xf1   : > { %v852_v2 = vadd.f32 %v3553_v38, %v851_v1  ;;  %3189 = vmatprep.mubr.msk.f32.mxu1 %vm1011_vm2, %v976_v62  ;;  %v979_v5 = vmax.f32 %v857_v0, 0.0 }
  0xf2   : > { %v3145_v3 = vpop.f32.mrf.mxu0  ;;  %3190 = vmatmul.mubr.msk.f32.gmra.mxu1 %vm1011_vm2, %v977_v63 }
  0xf3   : > { %v978_v4 = vmax.f32 %v852_v2, 0.0  ;;  %v867_v6 = vadd.f32 %v3145_v3, %v3553_v38 }
  0xf4   : > { %v861_v7 = vpop.f32.mrf.mxu0 }
  0xf5   : > { %v862_v8 = vadd.f32 %v3553_v38, %v861_v7  ;;  %3192 = vmatprep.mubr.msk.f32.mxu1 %vm1011_vm2, %v978_v4  ;;  %v981_v11 = vmax.f32 %v867_v6, 0.0 }
  0xf6   : > { %v3148_v9 = vpop.f32.mrf.mxu0  ;;  %3193 = vmatmul.mubr.msk.f32.gmra.mxu1 %vm1011_vm2, %v979_v5 }
  0xf7   : > { %v980_v10 = vmax.f32 %v862_v8, 0.0  ;;  %v877_v12 = vadd.f32 %v3148_v9, %v3553_v38  ;;  %v4364_v8 = vmov 0.0   ;;  %v1696_v9 = vld [vmem:[%s4343_s7 + $0x10] sm:$0xff] }
  0xf8   : > { %v871_v13 = vpop.f32.mrf.mxu0  ;;  %1394 = vst.msk [vmem:[#allocation4] sm:$0xff] %vm1366_vm3, %v4364_v8  ;;  %1405 = vst.msk [vmem:[#allocation5] sm:$0xff] %vm1366_vm3, %v4364_v8 }
  0xf9   : > { %v872_v14 = vadd.f32 %v3553_v38, %v871_v13  ;;  %3195 = vmatprep.mubr.msk.f32.mxu1 %vm1011_vm2, %v980_v10  ;;  %v983_v17 = vmax.f32 %v877_v12, 0.0  ;;  %1408 = vst.msk [vmem:[#allocation5 + $0x10] sm:$0x1] %vm1375_vm4, %v4364_v8  ;;  %1377 = vst.msk [vmem:[#allocation3 + $0x10] sm:$0x1] %vm1375_vm4, %v4364_v8  ;;  %v1695_v10 = vld [vmem:[%s4343_s7 + $0x8] sm:$0xff] }
  0xfa   : > { %v3151_v15 = vpop.f32.mrf.mxu0  ;;  %3196 = vmatmul.mubr.msk.f32.gmra.mxu1 %vm1011_vm2, %v981_v11  ;;  %1378 = vst.msk [vmem:[#allocation3 + $0x20] sm:$0x1] %vm1375_vm4, %v4364_v8  ;;  %1379 = vst.msk [vmem:[#allocation3 + $0x30] sm:$0x1] %vm1375_vm4, %v4364_v8  ;;  %v1694_v11 = vld [vmem:[%s4343_s7] sm:$0xff]  ;;  %v1836_v12 = vld [vmem:[%s4345_s9 + $0x10] sm:$0xff] }
  0xfb   : > { %v982_v16 = vmax.f32 %v872_v14, 0.0  ;;  %v887_v18 = vadd.f32 %v3151_v15, %v3553_v38  ;;  %1380 = vst.msk [vmem:[#allocation3 + $0x40] sm:$0x1] %vm1375_vm4, %v4364_v8  ;;  %1381 = vst.msk [vmem:[#allocation3 + $0x50] sm:$0x1] %vm1375_vm4, %v4364_v8  ;;  %v1835_v13 = vld [vmem:[%s4345_s9 + $0x8] sm:$0xff]  ;;  %3248 = vmatprep.subr.mxu0 %v1836_v12 }
  0xfc   : > { %v881_v19 = vpop.f32.mrf.mxu0  ;;  %1382 = vst.msk [vmem:[#allocation3 + $0x60] sm:$0x1] %vm1375_vm4, %v4364_v8  ;;  %1383 = vst.msk [vmem:[#allocation3 + $0x70] sm:$0x1] %vm1375_vm4, %v4364_v8  ;;  %3249 = vmatpush3.msra.mxu0 %v1836_v12  ;;  %v1834_v14 = vld [vmem:[%s4345_s9] sm:$0xff] }
  0xfd   : > { %v882_v20 = vadd.f32 %v3553_v38, %v881_v19  ;;  %3198 = vmatprep.mubr.msk.f32.mxu1 %vm1011_vm2, %v982_v16  ;;  %v985_v23 = vmax.f32 %v887_v18, 0.0  ;;  %1384 = vst.msk [vmem:[#allocation3 + $0x80] sm:$0x1] %vm1375_vm4, %v4364_v8  ;;  %1395 = vst.msk [vmem:[#allocation4 + $0x8] sm:$0x1] %vm1375_vm4, %v4364_v8  ;;  %3250 = vmatprep.subr.mxu0 %v1835_v13 }
  0xfe   : > { %v3154_v21 = vpop.f32.mrf.mxu0  ;;  %3199 = vmatmul.mubr.msk.f32.gmra.mxu1 %vm1011_vm2, %v983_v17  ;;  %1406 = vst.msk [vmem:[#allocation5 + $0x8] sm:$0x1] %vm1375_vm4, %v4364_v8  ;;  %1409 = vst.msk [vmem:[#allocation5 + $0x20] sm:$0x1] %vm1375_vm4, %v4364_v8  ;;  %3251 = vmatpush3.msra.mxu0 %v1835_v13  ;;  %v3685_v15 = vld [vmem:[%s4340_s4] ss:$0 sm:$0xff] }
  0xff   : > { %v984_v22 = vmax.f32 %v882_v20, 0.0  ;;  %v897_v24 = vadd.f32 %v3154_v21, %v3553_v38  ;;  %1410 = vst.msk [vmem:[#allocation5 + $0x30] sm:$0x1] %vm1375_vm4, %v4364_v8  ;;  %1411 = vst.msk [vmem:[#allocation5 + $0x40] sm:$0x1] %vm1375_vm4, %v4364_v8  ;;  %3252 = vmatprep.subr.mxu0 %v1834_v14 }
 0x100   : > { %v891_v25 = vpop.f32.mrf.mxu0  ;;  %1412 = vst.msk [vmem:[#allocation5 + $0x50] sm:$0x1] %vm1375_vm4, %v4364_v8  ;;  %1413 = vst.msk [vmem:[#allocation5 + $0x60] sm:$0x1] %vm1375_vm4, %v4364_v8  ;;  %3253 = vmatpush3.msra.mxu0 %v1834_v14 }
 0x101   : > { %v892_v26 = vadd.f32 %v3553_v38, %v891_v25  ;;  %3201 = vmatprep.mubr.msk.f32.mxu1 %vm1011_vm2, %v984_v22  ;;  %v987_v29 = vmax.f32 %v897_v24, 0.0  ;;  %1414 = vst.msk [vmem:[#allocation5 + $0x70] sm:$0x1] %vm1375_vm4, %v4364_v8  ;;  %1415 = vst.msk [vmem:[#allocation5 + $0x80] sm:$0x1] %vm1375_vm4, %v4364_v8 }
 0x102   : > { %v3157_v27 = vpop.f32.mrf.mxu0  ;;  %3202 = vmatmul.mubr.msk.f32.gmra.mxu1 %vm1011_vm2, %v985_v23  ;;  %1407 = vst.msk [vmem:[#allocation5] sm:$0x1] %vm1375_vm4, %v4364_v8 }
 0x103   : > { %v986_v28 = vmax.f32 %v892_v26, 0.0  ;;  %v907_v30 = vadd.f32 %v3157_v27, %v3553_v38 }
 0x104   : > { %v901_v31 = vpop.f32.mrf.mxu0  ;;  %v1447_v12 = vld [vmem:[#allocation4 + $0x1] sm:$0xff] }
 0x105   : > { %v902_v32 = vadd.f32 %v3553_v38, %v901_v31  ;;  %3204 = vmatprep.mubr.msk.f32.mxu1 %vm1011_vm2, %v986_v28  ;;  %v989_v35 = vmax.f32 %v907_v30, 0.0 }
 0x106   : > { %v3160_v33 = vpop.f32.mrf.mxu0  ;;  %3205 = vmatmul.mubr.msk.f32.gmra.mxu1 %vm1011_vm2, %v987_v29 }
 0x107   : > { %v988_v34 = vmax.f32 %v902_v32, 0.0  ;;  %v917_v36 = vadd.f32 %v3160_v33, %v3553_v38 }
 0x108   : > { %v911_v37 = vpop.f32.mrf.mxu0 }
 0x109   : > { %v912_v39 = vadd.f32 %v3553_v38, %v911_v37  ;;  %3207 = vmatprep.mubr.msk.f32.mxu1 %vm1011_vm2, %v988_v34  ;;  %v991_v42 = vmax.f32 %v917_v36, 0.0 }
 0x10a   : > { %v3163_v40 = vpop.f32.mrf.mxu0  ;;  %3208 = vmatmul.mubr.msk.f32.gmra.mxu1 %vm1011_vm2, %v989_v35 }
 0x10b   : > { %v990_v41 = vmax.f32 %v912_v39, 0.0  ;;  %v927_v43 = vadd.f32 %v3163_v40, %v3553_v38 }
 0x10c   : > { %v921_v44 = vpop.f32.mrf.mxu0 }
 0x10d   : > { %v922_v45 = vadd.f32 %v3553_v38, %v921_v44  ;;  %3210 = vmatprep.mubr.msk.f32.mxu1 %vm1011_vm2, %v990_v41  ;;  %v993_v48 = vmax.f32 %v927_v43, 0.0 }
 0x10e   : > { %v3166_v46 = vpop.f32.mrf.mxu0  ;;  %3211 = vmatmul.mubr.msk.f32.gmra.mxu1 %vm1011_vm2, %v991_v42 }
 0x10f   : > { %v992_v47 = vmax.f32 %v922_v45, 0.0  ;;  %v937_v49 = vadd.f32 %v3166_v46, %v3553_v38 }
 0x110   : > { %v931_v50 = vpop.f32.mrf.mxu0 }
 0x111   : > { %v932_v51 = vadd.f32 %v3553_v38, %v931_v50  ;;  %3213 = vmatprep.mubr.msk.f32.mxu1 %vm1011_vm2, %v992_v47  ;;  %v995_v54 = vmax.f32 %v937_v49, 0.0  ;;  %v4358_v50 = vlaneseq }
 0x112   : > { %v3169_v52 = vpop.f32.mrf.mxu0  ;;  %3214 = vmatmul.mubr.msk.f32.gmra.mxu1 %vm1011_vm2, %v993_v48 }
 0x113   : > { %v994_v53 = vmax.f32 %v932_v51, 0.0  ;;  %v947_v55 = vadd.f32 %v3169_v52, %v3553_v38 }
 0x114   : > { %v941_v56 = vpop.f32.mrf.mxu0 }
 0x115   : > { %v942_v57 = vadd.f32 %v3553_v38, %v941_v56  ;;  %3216 = vmatprep.mubr.msk.f32.mxu1 %vm1011_vm2, %v994_v53  ;;  %v997_v60 = vmax.f32 %v947_v55, 0.0 }
 0x116   : > { %v3172_v58 = vpop.f32.mrf.mxu0  ;;  %3217 = vmatmul.mubr.msk.f32.gmra.mxu1 %vm1011_vm2, %v995_v54 }
 0x117   : > { %v996_v59 = vmax.f32 %v942_v57, 0.0  ;;  %v957_v61 = vadd.f32 %v3172_v58, %v3553_v38  ;;  %v3712_v57 = vshrl.u32 %v4358_v50, 7 }
 0x118   : > { %v951_v62 = vpop.f32.mrf.mxu0 }
 0x119   : > { %v952_v63 = vadd.f32 %v3553_v38, %v951_v62  ;;  %3219 = vmatprep.mubr.msk.f32.mxu1 %vm1011_vm2, %v996_v59  ;;  %v999_v2 = vmax.f32 %v957_v61, 0.0  ;;  %4382 = vst [vmem:[#allocation7_spill] sm:$0xff] %v3712_v57  ;;  %v3717_v61 = vsub.s32 0, %v3712_v57  ;;  %v3720_v62 = vsub.s32 1, %v3712_v57 }
 0x11a   : > { %v3175_v0 = vpop.f32.mrf.mxu0  ;;  %3220 = vmatmul.mubr.msk.f32.gmra.mxu1 %vm1011_vm2, %v997_v60 }
 0x11b   : > { %v998_v1 = vmax.f32 %v952_v63, 0.0  ;;  %v967_v3 = vadd.f32 %v3175_v0, %v3553_v38  ;;  %4383 = vst [vmem:[#allocation8_spill] sm:$0xff] %v3717_v61  ;;  %4384 = vst [vmem:[#allocation9_spill] sm:$0xff] %v3720_v62 }
 0x11c   : > { %v961_v4 = vpop.f32.mrf.mxu0 }
 0x11d   : > { %v962_v5 = vadd.f32 %v3553_v38, %v961_v4  ;;  %3222 = vmatprep.mubr.msk.f32.mxu1 %vm1011_vm2, %v998_v1  ;;  %v1001_v7 = vmax.f32 %v967_v3, 0.0  ;;  %v1697_v38 = vld [vmem:[%s4343_s7 + $0x18] sm:$0xff]  ;;  %v3729_v4 = vld [vmem:[%s4341_s5] sm:$0xff] }
 0x11e   : > { %3223 = vmatmul.mubr.msk.f32.gmra.mxu1 %vm1011_vm2, %v999_v2  ;;  %3228 = vmatprep.subr.mxu1 %v1697_v38 }
 0x11f   : > { %v1000_v6 = vmax.f32 %v962_v5, 0.0  ;;  %3229 = vmatpush3.msra.mxu1 %v1697_v38  ;;  %v3740_v38 = vsub.s32 2, %v3712_v57 }
 0x120   : > { %3230 = vmatprep.subr.mxu1 %v1696_v9 }
 0x121   : > { %3225 = vmatprep.mubr.msk.f32.mxu1 %vm1011_vm2, %v1000_v6  ;;  %3231 = vmatpush3.msra.mxu1 %v1696_v9  ;;  %v3733_v6 = vrot.slane %v3729_v4, %v3717_v61  ;;  %4385 = vst [vmem:[#allocation10_spill] sm:$0xff] %v3740_v38 }
 0x122   : > { %3226 = vmatmul.mubr.msk.f32.gmra.mxu1 %vm1011_vm2, %v1001_v7  ;;  %3232 = vmatprep.subr.mxu1 %v1695_v10  ;;  %v3737_v7 = vrot.slane %v3729_v4, %v3720_v62 }
 0x123   : > { %3233 = vmatpush3.msra.mxu1 %v1695_v10 }
 0x124   : > { %3234 = vmatprep.subr.mxu1 %v1694_v11 }
 0x125   : > { %3235 = vmatpush3.msra.mxu1 %v1694_v11  ;;  %v1427_v11 = vld [vmem:[#allocation5] sm:$0xff] }
 0x1a6   : > { %v3182_v16 = vpop.f32.mrf.mxu1 }
 0x1a7   : > { %v1180_v17 = vadd.f32 %v3182_v16, %v3685_v15 }
 0x1a8   : > { %v1174_v18 = vpop.f32.mrf.mxu1 }
 0x1a9   : > { %v1334_v19 = vmax.f32 %v1180_v17, 0.0  ;;  %v1175_v20 = vadd.f32 %v3685_v15, %v1174_v18  ;;  %v1439_v18 = vmul.f32 %v3733_v6, %v1427_v11 }
 0x1aa   : > { %v3185_v21 = vpop.f32.mrf.mxu1 }
 0x1ab   : > { %1368 = vst.msk [vmem:[#allocation2 + $0x21] sm:$0xff] %vm1366_vm3, %v1334_v19  ;;  %v1333_v22 = vmax.f32 %v1175_v20, 0.0  ;;  %v1190_v23 = vadd.f32 %v3185_v21, %v3685_v15  ;;  %v1459_v19 = vmul.f32 %v3737_v7, %v1447_v12  ;;  %v3750_v20 = vrot.slane %v3729_v4, %v3740_v38 }
 0x1ac   : > { %v1184_v24 = vpop.f32.mrf.mxu1 }
 0x1ad   : > { %1367 = vst.msk [vmem:[#allocation2 + $0x11] sm:$0xff] %vm1366_vm3, %v1333_v22  ;;  %v1336_v25 = vmax.f32 %v1190_v23, 0.0  ;;  %v1185_v26 = vadd.f32 %v3685_v15, %v1184_v24  ;;  %v1475_v23 = vld [vmem:[#allocation5 + $0x1] sm:$0xff] }
 0x1ae   : > { %v3188_v27 = vpop.f32.mrf.mxu1 }
 0x1af   : > { %1370 = vst.msk [vmem:[#allocation2 + $0x41] sm:$0xff] %vm1366_vm3, %v1336_v25  ;;  %v1335_v28 = vmax.f32 %v1185_v26, 0.0  ;;  %v1200_v29 = vadd.f32 %v3188_v27, %v3685_v15  ;;  %v4361_v25 = vsub.s32 3, %v3712_v57 }
 0x1b0   : > { %v1194_v30 = vpop.f32.mrf.mxu1 }
 0x1b1   : > { %1369 = vst.msk [vmem:[#allocation2 + $0x31] sm:$0xff] %vm1366_vm3, %v1335_v28  ;;  %v1338_v31 = vmax.f32 %v1200_v29, 0.0  ;;  %v1195_v32 = vadd.f32 %v3685_v15, %v1194_v30  ;;  %v1467_v29 = vadd.f32 %v1459_v19, %v1439_v18  ;;  %v1487_v30 = vmul.f32 %v3750_v20, %v1475_v23 }
 0x1b2   : > { %v3191_v33 = vpop.f32.mrf.mxu1 }
 0x1b3   : > { %1372 = vst.msk [vmem:[#allocation2 + $0x61] sm:$0xff] %vm1366_vm3, %v1338_v31  ;;  %v1337_v34 = vmax.f32 %v1195_v32, 0.0  ;;  %v1210_v35 = vadd.f32 %v3191_v33, %v3685_v15 }
 0x1b4   : > { %v1204_v36 = vpop.f32.mrf.mxu1 }
 0x1b5   : > { %1371 = vst.msk [vmem:[#allocation2 + $0x51] sm:$0xff] %vm1366_vm3, %v1337_v34  ;;  %v1340_v37 = vmax.f32 %v1210_v35, 0.0  ;;  %v1205_v39 = vadd.f32 %v3685_v15, %v1204_v36  ;;  %v3763_v35 = vrot.slane %v3729_v4, %v4361_v25 }
 0x1b6   : > { %v3194_v40 = vpop.f32.mrf.mxu1 }
 0x1b7   : > { %1374 = vst.msk [vmem:[#allocation2 + $0x81] sm:$0xff] %vm1366_vm3, %v1340_v37  ;;  %v1339_v41 = vmax.f32 %v1205_v39, 0.0  ;;  %v1220_v42 = vadd.f32 %v3194_v40, %v3685_v15  ;;  %v1495_v40 = vadd.f32 %v1487_v30, %v1467_v29 }
 0x1b8   : > { %v1214_v43 = vpop.f32.mrf.mxu1 }
 0x1b9   : > { %1373 = vst.msk [vmem:[#allocation2 + $0x71] sm:$0xff] %vm1366_vm3, %v1339_v41  ;;  %v1342_v44 = vmax.f32 %v1220_v42, 0.0  ;;  %v1215_v45 = vadd.f32 %v3685_v15, %v1214_v43  ;;  %v4360_v42 = vsub.s32 4, %v3712_v57 }
 0x1ba   : > { %v3197_v46 = vpop.f32.mrf.mxu1 }
 0x1bb   : > { %1387 = vst.msk [vmem:[#allocation3 + $0x21] sm:$0xff] %vm1366_vm3, %v1342_v44  ;;  %v1341_v47 = vmax.f32 %v1215_v45, 0.0  ;;  %v1230_v48 = vadd.f32 %v3197_v46, %v3685_v15  ;;  %v4359_v46 = vsub.s32 5, %v3712_v57 }
 0x1bc   : > { %v1224_v49 = vpop.f32.mrf.mxu1 }
 0x1bd   : > { %1386 = vst.msk [vmem:[#allocation3 + $0x11] sm:$0xff] %vm1366_vm3, %v1341_v47  ;;  %v1344_v51 = vmax.f32 %v1230_v48, 0.0  ;;  %v1225_v52 = vadd.f32 %v3685_v15, %v1224_v49  ;;  %v1531_v49 = vld [vmem:[#allocation2 + $0x11] sm:$0xff] }
 0x1be   : > { %v3200_v53 = vpop.f32.mrf.mxu1 }
 0x1bf   : > { %1389 = vst.msk [vmem:[#allocation3 + $0x41] sm:$0xff] %vm1366_vm3, %v1344_v51  ;;  %v1343_v54 = vmax.f32 %v1225_v52, 0.0  ;;  %v1240_v55 = vadd.f32 %v3200_v53, %v3685_v15  ;;  %v4363_v51 = vsub.s32 6, %v3712_v57  ;;  %v4362_v52 = vsub.s32 7, %v3712_v57 }
 0x1c0   : > { %v1234_v56 = vpop.f32.mrf.mxu1 }
 0x1c1   : > { %1388 = vst.msk [vmem:[#allocation3 + $0x31] sm:$0xff] %vm1366_vm3, %v1343_v54  ;;  %v1346_v58 = vmax.f32 %v1240_v55, 0.0  ;;  %v1235_v59 = vadd.f32 %v3685_v15, %v1234_v56  ;;  %v1542_v55 = vrot.slane %v3729_v4, %v4360_v42 }
 0x1c2   : > { %v3203_v60 = vpop.f32.mrf.mxu1 }
 0x1c3   : > { %1391 = vst.msk [vmem:[#allocation3 + $0x61] sm:$0xff] %vm1366_vm3, %v1346_v58  ;;  %v1345_v63 = vmax.f32 %v1235_v59, 0.0  ;;  %v1250_v0 = vadd.f32 %v3203_v60, %v3685_v15  ;;  %v1532_v59 = vld [vmem:[#allocation2 + $0x21] sm:$0xff]  ;;  %v1533_v60 = vld [vmem:[#allocation2 + $0x31] sm:$0xff] }
 0x1c4   : > { %v1244_v1 = vpop.f32.mrf.mxu1  ;;  %v1503_v33 = vld [vmem:[#allocation3 + $0x10] sm:$0xff]  ;;  %v3800_v23 = vmul.f32 %v1542_v55, %v1533_v60 }
 0x1c5   : > { %1390 = vst.msk [vmem:[#allocation3 + $0x51] sm:$0xff] %vm1366_vm3, %v1345_v63  ;;  %v1348_v2 = vmax.f32 %v1250_v0, 0.0  ;;  %v1245_v3 = vadd.f32 %v3685_v15, %v1244_v1  ;;  %v1515_v41 = vmul.f32 %v3763_v35, %v1503_v33  ;;  %v1534_v63 = vld [vmem:[#allocation2 + $0x41] sm:$0xff]  ;;  %v1543_v1 = vmul.f32 %v1542_v55, %v1531_v49 }
 0x1c6   : > { %v3206_v5 = vpop.f32.mrf.mxu1  ;;  %v1559_v12 = vld [vmem:[#allocation3 + $0x11] sm:$0xff]  ;;  %v1562_v30 = vld [vmem:[#allocation3 + $0x41] sm:$0xff] }
 0x1c7   : > { %1393 = vst.msk [vmem:[#allocation3 + $0x81] sm:$0xff] %vm1366_vm3, %v1348_v2  ;;  %v1347_v9 = vmax.f32 %v1245_v3, 0.0  ;;  %v1260_v10 = vadd.f32 %v3206_v5, %v3685_v15  ;;  %v1523_v54 = vadd.f32 %v1515_v41, %v1495_v40  ;;  %v3784_v2 = vrot.slane %v3729_v4, %v4359_v46  ;;  %v1535_v3 = vld [vmem:[#allocation2 + $0x51] sm:$0xff]  ;;  %v1536_v5 = vld [vmem:[#allocation2 + $0x61] sm:$0xff] }
 0x1c8   : > { %v1254_v13 = vpop.f32.mrf.mxu1  ;;  %v1505_v29 = vld [vmem:[#allocation3 + $0x30] sm:$0xff] }
 0x1c9   : > { %1392 = vst.msk [vmem:[#allocation3 + $0x71] sm:$0xff] %vm1366_vm3, %v1347_v9  ;;  %v1350_v14 = vmax.f32 %v1260_v10, 0.0  ;;  %v1255_v16 = vadd.f32 %v3685_v15, %v1254_v13  ;;  %v1538_v9 = vld [vmem:[#allocation2 + $0x81] sm:$0xff]  ;;  %v3791_v13 = vrot.slane %v3729_v4, %v4363_v51  ;;  %v1551_v19 = vadd.f32 %v1543_v1, %v1523_v54 }
 0x1ca   : > { %v3209_v17 = vpop.f32.mrf.mxu1  ;;  %v1564_v40 = vld [vmem:[#allocation3 + $0x61] sm:$0xff]  ;;  %v3833_v60 = vmul.f32 %v3784_v2, %v1562_v30 }
 0x1cb   : > { %1398 = vst.msk [vmem:[#allocation4 + $0x21] sm:$0xff] %vm1366_vm3, %v1350_v14  ;;  %v1349_v21 = vmax.f32 %v1255_v16, 0.0  ;;  %v1270_v22 = vadd.f32 %v3209_v17, %v3685_v15  ;;  %v3796_v14 = vrot.slane %v3729_v4, %v4362_v52  ;;  %v1504_v16 = vld [vmem:[#allocation3 + $0x20] sm:$0xff]  ;;  %v1561_v4 = vld [vmem:[#allocation3 + $0x31] sm:$0xff] }
 0x1cc   : > { %v1264_v24 = vpop.f32.mrf.mxu1  ;;  %v1537_v17 = vld [vmem:[#allocation2 + $0x71] sm:$0xff]  ;;  %v1563_v49 = vld [vmem:[#allocation3 + $0x51] sm:$0xff] }
 0x1cd   : > { %1397 = vst.msk [vmem:[#allocation4 + $0x11] sm:$0xff] %vm1366_vm3, %v1349_v21  ;;  %v1352_v26 = vmax.f32 %v1270_v22, 0.0  ;;  %v1265_v27 = vadd.f32 %v3685_v15, %v1264_v24  ;;  %v3798_v21 = vmul.f32 %v1542_v55, %v1532_v59  ;;  %v1560_v22 = vld [vmem:[#allocation3 + $0x21] sm:$0xff]  ;;  %v3814_v41 = vmul.f32 %v1542_v55, %v1537_v17 }
 0x1ce   : > { %v3212_v28 = vpop.f32.mrf.mxu1  ;;  %v1506_v24 = vld [vmem:[#allocation3 + $0x40] sm:$0xff]  ;;  %v3827_v59 = vmul.f32 %v3763_v35, %v1505_v29 }
 0x1cf   : > { %1400 = vst.msk [vmem:[#allocation4 + $0x41] sm:$0xff] %vm1366_vm3, %v1352_v26  ;;  %v1351_v31 = vmax.f32 %v1265_v27, 0.0  ;;  %v1280_v32 = vadd.f32 %v3212_v28, %v3685_v15  ;;  %v3802_v26 = vmul.f32 %v1542_v55, %v1534_v63  ;;  %v1566_v54 = vld [vmem:[#allocation3 + $0x81] sm:$0xff] }
 0x1d0   : > { %v1274_v34 = vpop.f32.mrf.mxu1  ;;  %v1509_v63 = vld [vmem:[#allocation3 + $0x70] sm:$0xff] }
 0x1d1   : > { %1399 = vst.msk [vmem:[#allocation4 + $0x31] sm:$0xff] %vm1366_vm3, %v1351_v31  ;;  %v1354_v36 = vmax.f32 %v1280_v32, 0.0  ;;  %v1275_v37 = vadd.f32 %v3685_v15, %v1274_v34  ;;  %v3806_v31 = vmul.f32 %v1542_v55, %v1535_v3  ;;  %v3808_v32 = vmul.f32 %v1542_v55, %v1536_v5 }
 0x1d2   : > { %v3215_v39 = vpop.f32.mrf.mxu1  ;;  %v1571_v34 = vmul.f32 %v3784_v2, %v1559_v12 }
 0x1d3   : > { %1402 = vst.msk [vmem:[#allocation4 + $0x61] sm:$0xff] %vm1366_vm3, %v1354_v36  ;;  %v1353_v43 = vmax.f32 %v1275_v37, 0.0  ;;  %v1290_v44 = vadd.f32 %v3215_v39, %v3685_v15  ;;  %v3812_v36 = vmul.f32 %v3763_v35, %v1504_v16  ;;  %v1507_v37 = vld [vmem:[#allocation3 + $0x50] sm:$0xff]  ;;  %v1508_v39 = vld [vmem:[#allocation3 + $0x60] sm:$0xff] }
 0x1d4   : > { %v1284_v45 = vpop.f32.mrf.mxu1  ;;  %v1448_v1 = vld [vmem:[#allocation4 + $0x11] sm:$0xff]  ;;  %v3844_v17 = vmul.f32 %v3763_v35, %v1507_v37 }
 0x1d5   : > { %1401 = vst.msk [vmem:[#allocation4 + $0x51] sm:$0xff] %vm1366_vm3, %v1353_v43  ;;  %v1356_v47 = vmax.f32 %v1290_v44, 0.0  ;;  %v1285_v48 = vadd.f32 %v3685_v15, %v1284_v45  ;;  %v3816_v43 = vmul.f32 %v1542_v55, %v1538_v9  ;;  %v3830_v55 = vmul.f32 %v3784_v2, %v1561_v4  ;;  %v1616_v9 = vld [vmem:[#allocation4 + $0x21] sm:$0xff] }
 0x1d6   : > { %v3218_v53 = vpop.f32.mrf.mxu1  ;;  %v1618_v16 = vld [vmem:[#allocation4 + $0x41] sm:$0xff]  ;;  %v3858_v4 = vmul.f32 %v3763_v35, %v1509_v63  ;;  %v1460_v37 = vmul.f32 %v3737_v7, %v1448_v1 }
 0x1d7   : > { %1404 = vst.msk [vmem:[#allocation4 + $0x81] sm:$0xff] %vm1366_vm3, %v1356_v47  ;;  %v1355_v56 = vmax.f32 %v1285_v48, 0.0  ;;  %v1300_v58 = vadd.f32 %v3218_v53, %v3685_v15  ;;  %v3821_v47 = vmul.f32 %v3784_v2, %v1560_v22  ;;  %v3824_v48 = vmul.f32 %v3763_v35, %v1506_v24  ;;  %v1510_v53 = vld [vmem:[#allocation3 + $0x80] sm:$0xff] }
 0x1d8   : > { %v1294_v0 = vpop.f32.mrf.mxu1  ;;  %v3853_v22 = vmul.f32 %v3784_v2, %v1566_v54 }
 0x1d9   : > { %1403 = vst.msk [vmem:[#allocation4 + $0x71] sm:$0xff] %vm1366_vm3, %v1355_v56  ;;  %v1358_v10 = vmax.f32 %v1300_v58, 0.0  ;;  %v1295_v11 = vadd.f32 %v3685_v15, %v1294_v0  ;;  %v1579_v58 = vadd.f32 %v1571_v34, %v1551_v19  ;;  %v1565_v0 = vld [vmem:[#allocation3 + $0x71] sm:$0xff]  ;;  %v3850_v19 = vmul.f32 %v3763_v35, %v1510_v53 }
 0x1da   : > { %v3221_v18 = vpop.f32.mrf.mxu1  ;;  %v1620_v29 = vld [vmem:[#allocation4 + $0x61] sm:$0xff]  ;;  %v3861_v30 = vmul.f32 %v3784_v2, %v1565_v0  ;;  %v1627_v34 = vmul.f32 %v3796_v14, %v1448_v1  ;;  %v1463_v53 = vmul.f32 %v1618_v16, %v3737_v7 }
 0x1db   : > { %1418 = vst.msk [vmem:[#allocation5 + $0x21] sm:$0xff] %vm1366_vm3, %v1358_v10  ;;  %v1357_v27 = vmax.f32 %v1295_v11, 0.0  ;;  %v1310_v28 = vadd.f32 %v3221_v18, %v3685_v15  ;;  %v3838_v10 = vmul.f32 %v3763_v35, %v1508_v39  ;;  %v3841_v11 = vmul.f32 %v3784_v2, %v1564_v40 }
 0x1dc   : > { %v1304_v33 = vpop.f32.mrf.mxu1  ;;  %v3847_v18 = vmul.f32 %v3784_v2, %v1563_v49  ;;  %v3866_v40 = vmul.f32 %v3796_v14, %v1616_v9  ;;  %v3872_v2 = vmul.f32 %v3796_v14, %v1618_v16  ;;  %v1619_v54 = vld [vmem:[#allocation4 + $0x51] sm:$0xff] }
 0x1dd   : > { %1417 = vst.msk [vmem:[#allocation5 + $0x11] sm:$0xff] %vm1366_vm3, %v1357_v27  ;;  %v1360_v44 = vmax.f32 %v1310_v28, 0.0  ;;  %v1305_v45 = vadd.f32 %v3685_v15, %v1304_v33  ;;  %v1617_v28 = vld [vmem:[#allocation4 + $0x31] sm:$0xff]  ;;  %v3892_v25 = vmul.f32 %v3796_v14, %v1619_v54 }
 0x1de   : > { %v3224_v56 = vpop.f32.mrf.mxu1  ;;  %v3877_v1 = vmul.f32 %v3796_v14, %v1617_v28 }
 0x1df   : > { %1420 = vst.msk [vmem:[#allocation5 + $0x41] sm:$0xff] %vm1366_vm3, %v1360_v44  ;;  %v1359_v3 = vmax.f32 %v1305_v45, 0.0  ;;  %v1320_v5 = vadd.f32 %v3224_v56, %v3685_v15  ;;  %v1461_v44 = vmul.f32 %v1616_v9, %v3737_v7 }
 0x1e0   : > { %v1314_v12 = vpop.f32.mrf.mxu1  ;;  %v3883_v9 = vld [vmem:[#allocation4 + $0x71] sm:$0xff] }
 0x1e1   : > { %1419 = vst.msk [vmem:[#allocation5 + $0x31] sm:$0xff] %vm1366_vm3, %v1359_v3  ;;  %v1362_v24 = vmax.f32 %v1320_v5, 0.0  ;;  %v1315_v27 = vadd.f32 %v3685_v15, %v1314_v12  ;;  %v1462_v3 = vmul.f32 %v1617_v28, %v3737_v7  ;;  %v3881_v5 = vmul.f32 %v3796_v14, %v1620_v29 }
 0x1e2   : > { %v3227_v33 = vpop.f32.mrf.mxu1  ;;  %v1588_v39 = vld [vmem:[#allocation5 + $0x20] sm:$0xff] }
 0x1e3   : > { %1422 = vst.msk [vmem:[#allocation5 + $0x61] sm:$0xff] %vm1366_vm3, %v1362_v24  ;;  %v1361_v45 = vmax.f32 %v1315_v27, 0.0  ;;  %v1330_v35 = vadd.f32 %v3227_v33, %v3685_v15  ;;  %v1644_v49 = vld [vmem:[#allocation5 + $0x21] sm:$0xff]  ;;  %v1441_v0 = vmul.f32 %v1588_v39, %v3733_v6  ;;  %v1465_v33 = vmul.f32 %v1620_v29, %v3737_v7 }
 0x1e4   : > { %v1428_v56 = vld [vmem:[#allocation5 + $0x10] sm:$0xff]  ;;  %v1324_v63 = vpop.f32.mrf.mxu1  ;;  %v1489_v28 = vmul.f32 %v1644_v49, %v3750_v20  ;;  %v3900_v29 = vmul.f32 %v3883_v9, %v3737_v7 }
 0x1e5   : > { %1421 = vst.msk [vmem:[#allocation5 + $0x51] sm:$0xff] %vm1366_vm3, %v1361_v45  ;;  %v1364_v12 = vmax.f32 %v1330_v35, 0.0  ;;  %v1325_v16 = vadd.f32 %v3685_v15, %v1324_v63  ;;  %v1599_v24 = vmul.f32 %v3791_v13, %v1428_v56  ;;  %v1643_v27 = vld [vmem:[#allocation5 + $0x11] sm:$0xff]  ;;  %v1440_v50 = vmul.f32 %v3733_v6, %v1428_v56 }
 0x1e6   : > { %v1469_v46 = vadd.f32 %v1461_v44, %v1441_v0  ;;  %v1590_v42 = vld [vmem:[#allocation5 + $0x40] sm:$0xff]  ;;  %v1464_v15 = vmul.f32 %v1619_v54, %v3737_v7  ;;  %v3905_v44 = vld [vmem:[%s4341_s5 + $0x8] ss:$0 sm:$0xff]  ;;  %v1488_v63 = vmul.f32 %v1643_v27, %v3750_v20  ;;  %v1600_v7 = vmul.f32 %v3791_v13, %v1588_v39 }
 0x1e7   : > { %1424 = vst.msk [vmem:[#allocation5 + $0x81] sm:$0xff] %vm1366_vm3, %v1364_v12  ;;  %v1363_v45 = vmax.f32 %v1325_v16, 0.0  ;;  %v1607_v35 = vadd.f32 %v1599_v24, %v1579_v58  ;;  %v3895_v52 = vld [vmem:[#allocation5 + $0x41] sm:$0xff]  ;;  %v1468_v56 = vadd.f32 %v1460_v37, %v1440_v50  ;;  %v1443_v58 = vmul.f32 %v1590_v42, %v3733_v6  ;;  %v3916_v50 = vld [vmem:[%s4342_s6] ss:$0 sm:$0xff] }
 0x1e8   : > { %v1497_v0 = vadd.f32 %v1489_v28, %v1469_v46  ;;  %v1589_v12 = vld [vmem:[#allocation5 + $0x30] sm:$0xff]  ;;  %v1655_v24 = vmul.f32 %v3905_v44, %v1643_v27  ;;  %v1491_v8 = vmul.f32 %v3895_v52, %v3750_v20  ;;  %v1656_v27 = vmul.f32 %v3905_v44, %v1644_v49 }
 0x1e9   : > { %v1645_v16 = vld [vmem:[#allocation5 + $0x31] sm:$0xff]  ;;  %1423 = vst.msk [vmem:[#allocation5 + $0x71] sm:$0xff] %vm1366_vm3, %v1363_v45  ;;  %v1635_v54 = vadd.f32 %v1627_v34, %v1607_v35  ;;  %v1442_v51 = vmul.f32 %v1589_v12, %v3733_v6  ;;  %v1496_v37 = vadd.f32 %v1488_v63, %v1468_v56  ;;  %v1471_v28 = vadd.f32 %v1463_v53, %v1443_v58 }
 0x1ea   : > { %v1525_v46 = vadd.f32 %v3827_v59, %v1497_v0  ;;  %v1592_v45 = vld [vmem:[#allocation5 + $0x60] sm:$0xff]  ;;  %v1490_v39 = vmul.f32 %v1645_v16, %v3750_v20  ;;  %v1601_v63 = vmul.f32 %v3791_v13, %v1589_v12  ;;  %v1602_v58 = vmul.f32 %v3791_v13, %v1590_v42 }
 0x1eb   : > { %v1663_v34 = vadd.f32 %v1655_v24, %v1635_v54  ;;  %v1470_v35 = vadd.f32 %v1462_v3, %v1442_v51  ;;  %v1524_v57 = vadd.f32 %v3812_v36, %v1496_v37  ;;  %v1499_v62 = vadd.f32 %v1491_v8, %v1471_v28  ;;  %v1648_v8 = vld [vmem:[#allocation5 + $0x61] sm:$0xff] }
 0x1ec   : > { %v1553_v38 = vadd.f32 %v3800_v23, %v1525_v46  ;;  %v1591_v61 = vld [vmem:[#allocation5 + $0x50] sm:$0xff]  ;;  %v1445_v59 = vmul.f32 %v1592_v45, %v3733_v6 }
 0x1ed   : > { %v1647_v56 = vld [vmem:[#allocation5 + $0x51] sm:$0xff]  ;;  %v1678_v53 = vadd.f32 %v3916_v50, %v1663_v34  ;;  %v1498_v0 = vadd.f32 %v1490_v39, %v1470_v35  ;;  %v1552_v51 = vadd.f32 %v3798_v21, %v1524_v57  ;;  %v1527_v36 = vadd.f32 %v3844_v17, %v1499_v62 }
 0x1ee   : > { %v1581_v49 = vadd.f32 %v3830_v55, %v1553_v38  ;;  %v1444_v23 = vmul.f32 %v1591_v61, %v3733_v6  ;;  %v1492_v24 = vmul.f32 %v1647_v56, %v3750_v20  ;;  %v1473_v37 = vadd.f32 %v1465_v33, %v1445_v59 }
 0x1ef   : > { %v1686_v3 = vmax.f32 %v1678_v53, 0.0  ;;  %v1526_v54 = vadd.f32 %v3824_v48, %v1498_v0  ;;  %v1580_v12 = vadd.f32 %v3821_v47, %v1552_v51  ;;  %v1555_v42 = vadd.f32 %v3806_v31, %v1527_v36 }
 0x1f0   : > { %v1609_v46 = vadd.f32 %v1601_v63, %v1581_v49  ;;  %v1472_v28 = vadd.f32 %v1464_v15, %v1444_v23  ;;  %v1593_v57 = vld [vmem:[#allocation5 + $0x70] sm:$0xff]  ;;  %v1657_v62 = vmul.f32 %v3905_v44, %v1645_v16  ;;  %v1603_v21 = vmul.f32 %v3791_v13, %v1591_v61  ;;  %v1594_v23 = vld [vmem:[#allocation5 + $0x80] sm:$0xff] }
 0x1f1   : > { %3236 = vmatprep.mubr.msk.f32.mxu1 %vm1366_vm3, %v1686_v3  ;;  %v1554_v38 = vadd.f32 %v3802_v26, %v1526_v54  ;;  %v1493_v48 = vmul.f32 %v1648_v8, %v3750_v20  ;;  %v1608_v55 = vadd.f32 %v1600_v7, %v1580_v12  ;;  %v1583_v47 = vadd.f32 %v3847_v18, %v1555_v42  ;;  %v1649_v34 = vld [vmem:[#allocation5 + $0x71] sm:$0xff] }
 0x1f2   : > { %v1637_v17 = vadd.f32 %v3877_v1, %v1609_v46  ;;  %v1500_v33 = vadd.f32 %v1492_v24, %v1472_v28  ;;  %v1659_v15 = vmul.f32 %v3905_v44, %v1647_v56  ;;  %v1446_v16 = vmul.f32 %v1593_v57, %v3733_v6 }
 0x1f3   : > { %v1582_v31 = vadd.f32 %v3833_v60, %v1554_v38  ;;  %v1501_v35 = vadd.f32 %v1493_v48, %v1473_v37  ;;  %v1636_v26 = vadd.f32 %v3866_v40, %v1608_v55  ;;  %v1611_v61 = vadd.f32 %v1603_v21, %v1583_v47  ;;  %v1622_v37 = vld [vmem:[#allocation4 + $0x81] sm:$0xff] }
 0x1f4   : > { %v1665_v39 = vadd.f32 %v1657_v62, %v1637_v17  ;;  %v1528_v59 = vadd.f32 %v3838_v10, %v1500_v33  ;;  %v1474_v18 = vadd.f32 %v3900_v29, %v1446_v16  ;;  %v1494_v53 = vmul.f32 %v1649_v34, %v3750_v20 }
 0x1f5   : > { %v1610_v7 = vadd.f32 %v1602_v58, %v1582_v31  ;;  %v1529_v1 = vadd.f32 %v3858_v4, %v1501_v35  ;;  %v1664_v63 = vadd.f32 %v1656_v27, %v1636_v26  ;;  %v1639_v56 = vadd.f32 %v3892_v25, %v1611_v61 }
 0x1f6   : > { %v1680_v60 = vadd.f32 %v3916_v50, %v1665_v39  ;;  %v1556_v6 = vadd.f32 %v3808_v32, %v1528_v59  ;;  %v1658_v0 = vmul.f32 %v3905_v44, %v3895_v52  ;;  %v1502_v58 = vadd.f32 %v1494_v53, %v1474_v18 }
 0x1f7   : > { %v1638_v40 = vadd.f32 %v3872_v2, %v1610_v7  ;;  %v1557_v10 = vadd.f32 %v3814_v41, %v1529_v1  ;;  %v1679_v4 = vadd.f32 %v3916_v50, %v1664_v63  ;;  %v1667_v29 = vadd.f32 %v1659_v15, %v1639_v56  ;;  %v2294_v56 = vld [vmem:[%s4349_s13 + $0x28] sm:$0xff] }
 0x1f8   : > { %v1584_v20 = vadd.f32 %v3841_v11, %v1556_v6  ;;  %v1604_v27 = vmul.f32 %v3791_v13, %v1592_v45  ;;  %v1605_v32 = vmul.f32 %v3791_v13, %v1593_v57  ;;  %v1530_v2 = vadd.f32 %v3850_v19, %v1502_v58  ;;  %v1650_v57 = vld [vmem:[#allocation5 + $0x81] sm:$0xff]  ;;  %v2293_v6 = vld [vmem:[%s4349_s13 + $0x20] sm:$0xff]  ;;  %3266 = vmatprep.subr.mxu1 %v2294_v56 }
 0x1f9   : > { %v1666_v51 = vadd.f32 %v1658_v0, %v1638_v40  ;;  %v1585_v25 = vadd.f32 %v3861_v30, %v1557_v10  ;;  %v1687_v49 = vmax.f32 %v1679_v4, 0.0  ;;  %v1688_v36 = vmax.f32 %v1680_v60, 0.0  ;;  %v2292_v40 = vld [vmem:[%s4349_s13 + $0x18] sm:$0xff]  ;;  %v2291_v0 = vld [vmem:[%s4349_s13 + $0x10] sm:$0xff]  ;;  %v2290_v10 = vld [vmem:[%s4349_s13 + $0x8] sm:$0xff] }
 0x1fa   : > { %v1612_v52 = vadd.f32 %v1604_v27, %v1584_v20  ;;  %v1633_v41 = vmul.f32 %v3796_v14, %v3883_v9  ;;  %v1682_v11 = vadd.f32 %v3916_v50, %v1667_v29  ;;  %v1558_v45 = vadd.f32 %v3816_v43, %v1530_v2  ;;  %v2289_v58 = vld [vmem:[%s4349_s13] sm:$0xff]  ;;  %v2434_v4 = vld [vmem:[%s4351_s15 + $0x18] sm:$0xff]  ;;  %v2433_v29 = vld [vmem:[%s4351_s15 + $0x10] sm:$0xff] }
 0x1fb   : > { %v1681_v3 = vadd.f32 %v3916_v50, %v1666_v51  ;;  %v1613_v54 = vadd.f32 %v1605_v32, %v1585_v25  ;;  %3237 = vmatmul.mubr.msk.f32.vlgmr.msra.gmra.mxu1 %vm1366_vm3, %v1687_v49  ;;  %v1660_v19 = vmul.f32 %v3905_v44, %v1648_v8  ;;  %v1661_v24 = vmul.f32 %v3905_v44, %v1649_v34  ;;  %v2949_v34 = vld [vmem:[%s4344_s8] ss:$0 sm:$0xff]  ;;  %v2432_v20 = vld [vmem:[%s4351_s15 + $0x8] sm:$0xff] }
 0x1fc   : > { %v1640_v30 = vadd.f32 %v3881_v5, %v1612_v52  ;;  %3239 = vmatprep.mubr.msk.f32.mxu1 %vm1366_vm3, %v1688_v36  ;;  %v1586_v46 = vadd.f32 %v3853_v22, %v1558_v45  ;;  %v1606_v42 = vmul.f32 %v3791_v13, %v1594_v23  ;;  %v1690_v43 = vmax.f32 %v1682_v11, 0.0  ;;  %3267 = vmatpush3.msra.mxu1 %v2294_v56  ;;  %v2019_v27 = vld [vmem:[%s4347_s11] sm:$0xff]  ;;  %v4387_v32 = vld [vmem:[#allocation8_spill] sm:$0xff]  ;;  %v4388_v52 = vld [vmem:[#allocation9_spill] sm:$0xff] }
 0x1fd   : > { %v1689_v9 = vmax.f32 %v1681_v3, 0.0  ;;  %v1641_v12 = vadd.f32 %v1633_v41, %v1613_v54  ;;  %v1634_v5 = vmul.f32 %v3796_v14, %v1622_v37  ;;  %v1662_v22 = vmul.f32 %v3905_v44, %v1650_v57  ;;  %3268 = vmatprep.subr.mxu1 %v2293_v6  ;;  %3290 = vmatprep.subr.mxu0 %v2434_v4  ;;  %v2958_v51 = vld [vmem:[%s4346_s10] ss:$0 sm:$0xff] }
 0x1fe   : > { %v1668_v28 = vadd.f32 %v1660_v19, %v1640_v30  ;;  %v1614_v38 = vadd.f32 %v1606_v42, %v1586_v46  ;;  %v4386_v60 = vmov 0.0   ;;  %3269 = vmatpush3.msra.mxu1 %v2293_v6  ;;  %v4078_v2 = vrot.slane %v2019_v27, %v4387_v32 }
 0x1ff   : > { %v1669_v62 = vadd.f32 %v1661_v24, %v1641_v12  ;;  %3240 = vmatmul.mubr.msk.f32.gmra.mxu1 %vm1366_vm3, %v1689_v9  ;;  %1983 = vst.msk [vmem:[#allocation6] sm:$0xff] %vm1982_vm6, %v4386_v60  ;;  %1987 = vst.msk [vmem:[#allocation6 + $0x90] sm:$0xff] %vm1982_vm6, %v4386_v60  ;;  %3270 = vmatprep.subr.mxu1 %v2292_v40  ;;  %v4081_v41 = vrot.slane %v2019_v27, %v4388_v52  ;;  %v4389_v9 = vld [vmem:[#allocation10_spill] sm:$0xff] }
 0x200   : > { %v1683_v8 = vadd.f32 %v3916_v50, %v1668_v28  ;;  %3242 = vmatprep.mubr.msk.f32.mxu1 %vm1366_vm3, %v1690_v43  ;;  %v1642_v48 = vadd.f32 %v1634_v5, %v1614_v38  ;;  %1991 = vst.msk [vmem:[#allocation6 + $0x10] sm:$0x1] %vm1989_vm7, %v4386_v60  ;;  %1990 = vst.msk [vmem:[#allocation6] sm:$0x1] %vm1989_vm7, %v4386_v60  ;;  %3271 = vmatpush3.msra.mxu1 %v2292_v40 }
 0x201   : > { %v1684_v21 = vadd.f32 %v3916_v50, %v1669_v62  ;;  %1992 = vst.msk [vmem:[#allocation6 + $0x20] sm:$0x1] %vm1989_vm7, %v4386_v60  ;;  %1993 = vst.msk [vmem:[#allocation6 + $0x30] sm:$0x1] %vm1989_vm7, %v4386_v60  ;;  %3272 = vmatprep.subr.mxu1 %v2291_v0  ;;  %v4087_v12 = vrot.slane %v2019_v27, %v4389_v9 }
 0x202   : > { %v1691_v55 = vmax.f32 %v1683_v8, 0.0  ;;  %v1670_v17 = vadd.f32 %v1662_v22, %v1642_v48  ;;  %1994 = vst.msk [vmem:[#allocation6 + $0x40] sm:$0x1] %vm1989_vm7, %v4386_v60  ;;  %1995 = vst.msk [vmem:[#allocation6 + $0x50] sm:$0x1] %vm1989_vm7, %v4386_v60  ;;  %3273 = vmatpush3.msra.mxu1 %v2291_v0  ;;  %v4390_v48 = vld [vmem:[#allocation7_spill] sm:$0xff] }
 0x203   : > { %v1692_v13 = vmax.f32 %v1684_v21, 0.0  ;;  %1996 = vst.msk [vmem:[#allocation6 + $0x60] sm:$0x1] %vm1989_vm7, %v4386_v60  ;;  %1997 = vst.msk [vmem:[#allocation6 + $0x70] sm:$0x1] %vm1989_vm7, %v4386_v60  ;;  %3274 = vmatprep.subr.mxu1 %v2290_v10  ;;  %v4391_v22 = vsub.s32 6, %v4390_v48 }
 0x204   : > { %3243 = vmatmul.mubr.msk.f32.gmra.mxu1 %vm1366_vm3, %v1691_v55  ;;  %v1685_v14 = vadd.f32 %v3916_v50, %v1670_v17  ;;  %1998 = vst.msk [vmem:[#allocation6 + $0x80] sm:$0x1] %vm1989_vm7, %v4386_v60  ;;  %1999 = vst.msk [vmem:[#allocation6 + $0x90] sm:$0x1] %vm1989_vm7, %v4386_v60 }
 0x205   : > { %3245 = vmatprep.mubr.msk.f32.mxu1 %vm1366_vm3, %v1692_v13  ;;  %2001 = vst.msk [vmem:[#allocation6 + $0x19] sm:$0x1] %vm1989_vm7, %v4386_v60  ;;  %2002 = vst.msk [vmem:[#allocation6 + $0x29] sm:$0x1] %vm1989_vm7, %v4386_v60  ;;  %3275 = vmatpush3.msra.mxu1 %v2290_v10  ;;  %v4094_v55 = vrot.slane %v2019_v27, %v4391_v22 }
 0x206   : > { %v1693_v47 = vmax.f32 %v1685_v14, 0.0  ;;  %2003 = vst.msk [vmem:[#allocation6 + $0x39] sm:$0x1] %vm1989_vm7, %v4386_v60  ;;  %2004 = vst.msk [vmem:[#allocation6 + $0x49] sm:$0x1] %vm1989_vm7, %v4386_v60  ;;  %3276 = vmatprep.subr.mxu1 %v2289_v58 }
 0x207   : > { %2005 = vst.msk [vmem:[#allocation6 + $0x59] sm:$0x1] %vm1989_vm7, %v4386_v60  ;;  %2006 = vst.msk [vmem:[#allocation6 + $0x69] sm:$0x1] %vm1989_vm7, %v4386_v60  ;;  %3277 = vmatpush3.msra.mxu1 %v2289_v58  ;;  %v2021_v36 = vld [vmem:[#allocation6] sm:$0xff] }
 0x208   : > { %3246 = vmatmul.mubr.msk.f32.gmra.mxu1 %vm1366_vm3, %v1693_v47  ;;  %2007 = vst.msk [vmem:[#allocation6 + $0x79] sm:$0x1] %vm1989_vm7, %v4386_v60  ;;  %2008 = vst.msk [vmem:[#allocation6 + $0x89] sm:$0x1] %vm1989_vm7, %v4386_v60  ;;  %v2033_v30 = vmul.f32 %v4078_v2, %v2021_v36  ;;  %v4100_v14 = vld [vmem:[%s4347_s11 + $0x8] ss:$0 sm:$0xff] }
 0x209   : > { %1985 = vst.msk [vmem:[#allocation6 + $0x8] sm:$0x3] %vm1984_vm8, %v4386_v60  ;;  %1988 = vst.msk [vmem:[#allocation6 + $0x98] sm:$0x3] %vm1984_vm8, %v4386_v60  ;;  %v4392_v47 = vsub.s32 7, %v4390_v48 }
 0x20a   : > { %2000 = vst.msk [vmem:[#allocation6 + $0x9] sm:$0x1] %vm1989_vm7, %v4386_v60  ;;  %2009 = vst.msk [vmem:[#allocation6 + $0x99] sm:$0x1] %vm1989_vm7, %v4386_v60 }
 0x210   : > { %v2041_v3 = vld [vmem:[#allocation6 + $0x1] sm:$0xff] }
 0x211   : > { %v2053_v37 = vmul.f32 %v4081_v41, %v2041_v3  ;;  %v2069_v42 = vld [vmem:[#allocation6 + $0x2] sm:$0xff] }
 0x212   : > { %v2081_v8 = vmul.f32 %v4087_v12, %v2069_v42 }
 0x213   : > { %v2061_v5 = vadd.f32 %v2053_v37, %v2033_v30 }
 0x2bb   : > { %v3238_v33 = vpop.f32.mrf.mxu1 }
 0x2bc   : > { %v1801_v15 = vadd.f32 %v3238_v33, %v2949_v34  ;;  %v4104_v33 = vrot.slane %v2019_v27, %v4392_v47 }
 0x2bd   : > { %v1795_v31 = vpop.f32.mrf.mxu1 }
 0x2be   : > { %v1796_v44 = vadd.f32 %v2949_v34, %v1795_v31 }
 0x2bf   : > { %v3241_v35 = vpop.f32.mrf.mxu1 }
 0x2c0   : > { %3254 = vmatprep.mubr.msk.f32.mxu0 %vm1844_vm5, %v1796_v44  ;;  %v1811_v50 = vadd.f32 %v3241_v35, %v2949_v34 }
 0x2c1   : > { %v1805_v16 = vpop.f32.mrf.mxu1  ;;  %3255 = vmatmul.mubr.msk.f32.vlgmr.msra.gmra.mxu0 %vm1844_vm5, %v1801_v15 }
 0x2c2   : > { %v1806_v26 = vadd.f32 %v2949_v34, %v1805_v16  ;;  %3291 = vmatpush3.msra.mxu0 %v2434_v4 }
 0x2c3   : > { %3292 = vmatprep.subr.mxu0 %v2433_v29 }
 0x2c4   : > { %v3244_v39 = vpop.f32.mrf.mxu1  ;;  %3257 = vmatprep.mubr.msk.f32.mxu0 %vm1844_vm5, %v1806_v26  ;;  %3293 = vmatpush3.msra.mxu0 %v2433_v29 }
 0x2c5   : > { %3258 = vmatmul.mubr.msk.f32.gmra.mxu0 %vm1844_vm5, %v1811_v50  ;;  %v1821_v7 = vadd.f32 %v3244_v39, %v2949_v34  ;;  %3294 = vmatprep.subr.mxu0 %v2432_v20  ;;  %v2089_v50 = vadd.f32 %v2081_v8, %v2061_v5 }
 0x2c6   : > { %v1815_v61 = vpop.f32.mrf.mxu1  ;;  %3295 = vmatpush3.msra.mxu0 %v2432_v20 }
 0x2c7   : > { %v1816_v59 = vadd.f32 %v2949_v34, %v1815_v61 }
 0x2c8   : > { %v3247_v1 = vpop.f32.mrf.mxu1 }
 0x2c9   : > { %3260 = vmatprep.mubr.msk.f32.mxu0 %vm1844_vm5, %v1816_v59  ;;  %v1831_v63 = vadd.f32 %v3247_v1, %v2949_v34 }
 0x2ca   : > { %3261 = vmatmul.mubr.msk.f32.gmra.mxu0 %vm1844_vm5, %v1821_v7  ;;  %v1825_v18 = vpop.f32.mrf.mxu1  ;;  %v4394_v7 = vsub.s32 4, %v4390_v48 }
 0x2cb   : > { %v1826_v53 = vadd.f32 %v2949_v34, %v1825_v18  ;;  %v4393_v34 = vsub.s32 3, %v4390_v48  ;;  %v4395_v18 = vsub.s32 5, %v4390_v48 }
 0x2cc   : > { %v4113_v1 = vrot.slane %v2019_v27, %v4394_v7 }
 0x2cd   : > { %3263 = vmatprep.mubr.msk.f32.mxu0 %vm1844_vm5, %v1826_v53  ;;  %v4108_v31 = vrot.slane %v2019_v27, %v4393_v34  ;;  %v4117_v53 = vrot.slane %v2019_v27, %v4395_v18 }
 0x2ce   : > { %3264 = vmatmul.mubr.msk.f32.gmra.mxu0 %vm1844_vm5, %v1831_v63 }
 0x381   : > { %v3256_v25 = vpop.f32.mrf.mxu0 }
 0x382   : > { %v1941_v49 = vadd.f32 %v3256_v25, %v2958_v51 }
 0x383   : > { %v1935_v23 = vpop.f32.mrf.mxu0 }
 0x384   : > { %v1975_v11 = vmax.f32 %v1941_v49, 0.0  ;;  %v1936_v54 = vadd.f32 %v2958_v51, %v1935_v23 }
 0x385   : > { %v3259_v45 = vpop.f32.mrf.mxu0 }
 0x386   : > { %2012 = vst.msk [vmem:[#allocation6 + $0x21] sm:$0xff] %vm1982_vm6, %v1975_v11  ;;  %v1974_v19 = vmax.f32 %v1936_v54, 0.0  ;;  %v1951_v24 = vadd.f32 %v3259_v45, %v2958_v51 }
 0x387   : > { %v1945_v46 = vpop.f32.mrf.mxu0 }
 0x388   : > { %2011 = vst.msk [vmem:[#allocation6 + $0x11] sm:$0xff] %vm1982_vm6, %v1974_v19  ;;  %v1977_v28 = vmax.f32 %v1951_v24, 0.0  ;;  %v1946_v57 = vadd.f32 %v2958_v51, %v1945_v46 }
 0x38a   : > { %v3262_v43 = vpop.f32.mrf.mxu0  ;;  %2014 = vst.msk [vmem:[#allocation6 + $0x41] sm:$0xff] %vm1982_vm6, %v1977_v28  ;;  %v1976_v62 = vmax.f32 %v1946_v57, 0.0 }
 0x38b   : > { %v1961_v38 = vadd.f32 %v3262_v43, %v2958_v51 }
 0x38c   : > { %v1955_v21 = vpop.f32.mrf.mxu0  ;;  %2013 = vst.msk [vmem:[#allocation6 + $0x31] sm:$0xff] %vm1982_vm6, %v1976_v62 }
 0x38d   : > { %v1979_v13 = vmax.f32 %v1961_v38, 0.0  ;;  %v1956_v17 = vadd.f32 %v2958_v51, %v1955_v21  ;;  %v2182_v44 = vld [vmem:[#allocation6 + $0x20] sm:$0xff] }
 0x38e   : > { %v2210_v15 = vld [vmem:[#allocation6 + $0x21] sm:$0xff]  ;;  %v3265_v26 = vpop.f32.mrf.mxu0  ;;  %v2194_v63 = vmul.f32 %v4094_v55, %v2182_v44  ;;  %v2110_v27 = vmul.f32 %v2182_v44, %v4108_v31  ;;  %v2035_v36 = vmul.f32 %v2182_v44, %v4078_v2 }
 0x38f   : > { %v2238_v35 = vld [vmem:[#allocation6 + $0x22] sm:$0xff]  ;;  %2016 = vst.msk [vmem:[#allocation6 + $0x61] sm:$0xff] %vm1982_vm6, %v1979_v13  ;;  %v1978_v16 = vmax.f32 %v1956_v17, 0.0  ;;  %v2022_v39 = vld [vmem:[#allocation6 + $0x10] sm:$0xff]  ;;  %v1971_v59 = vadd.f32 %v3265_v26, %v2958_v51  ;;  %v2222_v0 = vmul.f32 %v4104_v33, %v2210_v15  ;;  %v2055_v23 = vmul.f32 %v2210_v15, %v4081_v41 }
 0x390   : > { %v2042_v61 = vld [vmem:[#allocation6 + $0x11] sm:$0xff]  ;;  %v1965_v56 = vpop.f32.mrf.mxu0  ;;  %v2109_v6 = vmul.f32 %v4108_v31, %v2022_v39  ;;  %v2250_v10 = vmul.f32 %v4100_v14, %v2238_v35  ;;  %v2034_v58 = vmul.f32 %v4078_v2, %v2022_v39  ;;  %v2166_v46 = vmul.f32 %v2238_v35, %v4117_v53 }
 0x391   : > { %2015 = vst.msk [vmem:[#allocation6 + $0x51] sm:$0xff] %vm1982_vm6, %v1978_v16  ;;  %v2153_v40 = vld [vmem:[#allocation6 + $0x12] sm:$0xff]  ;;  %v1981_v4 = vmax.f32 %v1971_v59, 0.0  ;;  %v1966_v29 = vadd.f32 %v2958_v51, %v1965_v56  ;;  %v2054_v20 = vmul.f32 %v4081_v41, %v2042_v61  ;;  %v2137_v49 = vmul.f32 %v4113_v1, %v2042_v61  ;;  %v2184_v3 = vld [vmem:[#allocation6 + $0x40] sm:$0xff] }
 0x392   : > { %v2117_v25 = vadd.f32 %v2109_v6, %v2089_v50  ;;  %v2082_v45 = vmul.f32 %v2153_v40, %v4087_v12  ;;  %v2138_v51 = vmul.f32 %v2210_v15, %v4113_v1  ;;  %v2212_v19 = vld [vmem:[#allocation6 + $0x41] sm:$0xff]  ;;  %v2165_v37 = vmul.f32 %v4117_v53, %v2153_v40 }
 0x393   : > { %2018 = vst.msk [vmem:[#allocation6 + $0x81] sm:$0xff] %vm1982_vm6, %v1981_v4  ;;  %v1980_v11 = vmax.f32 %v1966_v29, 0.0  ;;  %v2062_v54 = vadd.f32 %v2054_v20, %v2034_v58  ;;  %v2183_v30 = vld [vmem:[#allocation6 + $0x30] sm:$0xff]  ;;  %v2083_v28 = vmul.f32 %v2238_v35, %v4087_v12  ;;  %v2063_v62 = vadd.f32 %v2055_v23, %v2035_v36  ;;  %v2240_v44 = vld [vmem:[#allocation6 + $0x42] sm:$0xff] }
 0x394   : > { %v2145_v24 = vadd.f32 %v2137_v49, %v2117_v25  ;;  %v2211_v42 = vld [vmem:[#allocation6 + $0x31] sm:$0xff]  ;;  %v2111_v38 = vmul.f32 %v2183_v30, %v4108_v31  ;;  %v2196_v5 = vmul.f32 %v4094_v55, %v2184_v3  ;;  %v2195_v21 = vmul.f32 %v4094_v55, %v2183_v30 }
 0x395   : > { %2017 = vst.msk [vmem:[#allocation6 + $0x71] sm:$0xff] %vm1982_vm6, %v1980_v11  ;;  %v2090_v57 = vadd.f32 %v2082_v45, %v2062_v54  ;;  %v2239_v43 = vld [vmem:[#allocation6 + $0x32] sm:$0xff]  ;;  %v2224_v22 = vmul.f32 %v4104_v33, %v2212_v19  ;;  %v2036_v13 = vmul.f32 %v2183_v30, %v4078_v2  ;;  %v2223_v47 = vmul.f32 %v4104_v33, %v2211_v42 }
 0x396   : > { %v2173_v8 = vadd.f32 %v2165_v37, %v2145_v24  ;;  %v2091_v34 = vadd.f32 %v2083_v28, %v2063_v62  ;;  %v2056_v15 = vmul.f32 %v2211_v42, %v4081_v41  ;;  %v2251_v16 = vmul.f32 %v4100_v14, %v2239_v43 }
 0x397   : > { %v2118_v17 = vadd.f32 %v2110_v27, %v2090_v57  ;;  %v2139_v26 = vmul.f32 %v2211_v42, %v4113_v1  ;;  %v2167_v50 = vmul.f32 %v2239_v43, %v4117_v53  ;;  %v2084_v7 = vmul.f32 %v2239_v43, %v4087_v12 }
 0x398   : > { %v2202_v35 = vadd.f32 %v2194_v63, %v2173_v8  ;;  %v2119_v61 = vadd.f32 %v2111_v38, %v2091_v34  ;;  %v2064_v59 = vadd.f32 %v2056_v15, %v2036_v13  ;;  %v2185_v18 = vld [vmem:[#allocation6 + $0x50] sm:$0xff]  ;;  %v2252_v6 = vmul.f32 %v4100_v14, %v2240_v44  ;;  %v4154_v63 = vld [vmem:[%s4348_s12] ss:$0 sm:$0xff] }
 0x399   : > { %v2146_v39 = vadd.f32 %v2138_v51, %v2118_v17  ;;  %v2112_v40 = vmul.f32 %v2184_v3, %v4108_v31  ;;  %v2037_v58 = vmul.f32 %v2184_v3, %v4078_v2  ;;  %v2213_v27 = vld [vmem:[#allocation6 + $0x51] sm:$0xff]  ;;  %v2057_v25 = vmul.f32 %v2212_v19, %v4081_v41  ;;  %v2186_v34 = vld [vmem:[#allocation6 + $0x60] sm:$0xff] }
 0x39a   : > { %v2230_v56 = vadd.f32 %v2222_v0, %v2202_v35  ;;  %v2147_v29 = vadd.f32 %v2139_v26, %v2119_v61  ;;  %v2092_v20 = vadd.f32 %v2084_v7, %v2064_v59  ;;  %v2140_v0 = vmul.f32 %v2212_v19, %v4113_v1  ;;  %v2241_v19 = vld [vmem:[#allocation6 + $0x52] sm:$0xff]  ;;  %v2242_v59 = vld [vmem:[#allocation6 + $0x62] sm:$0xff] }
 0x39b   : > { %v2174_v4 = vadd.f32 %v2166_v46, %v2146_v39  ;;  %v2085_v36 = vmul.f32 %v2240_v44, %v4087_v12  ;;  %v2113_v23 = vmul.f32 %v2185_v18, %v4108_v31  ;;  %v2065_v45 = vadd.f32 %v2057_v25, %v2037_v58 }
 0x39c   : > { %v2258_v49 = vadd.f32 %v2250_v10, %v2230_v56  ;;  %v2175_v3 = vadd.f32 %v2167_v50, %v2147_v29  ;;  %v2120_v54 = vadd.f32 %v2112_v40, %v2092_v20  ;;  %v2168_v30 = vmul.f32 %v2240_v44, %v4117_v53  ;;  %v2214_v44 = vld [vmem:[#allocation6 + $0x61] sm:$0xff]  ;;  %v2187_v29 = vld [vmem:[#allocation6 + $0x70] sm:$0xff] }
 0x39d   : > { %v2203_v11 = vadd.f32 %v2195_v21, %v2174_v4  ;;  %v2197_v24 = vmul.f32 %v4094_v55, %v2185_v18  ;;  %v2225_v37 = vmul.f32 %v4104_v33, %v2213_v27  ;;  %v2093_v28 = vadd.f32 %v2085_v36, %v2065_v45 }
 0x39e   : > { %v2273_v51 = vadd.f32 %v4154_v63, %v2258_v49  ;;  %v2204_v10 = vadd.f32 %v2196_v5, %v2175_v3  ;;  %v2148_v42 = vadd.f32 %v2140_v0, %v2120_v54  ;;  %v2141_v43 = vmul.f32 %v2213_v27, %v4113_v1  ;;  %v2215_v3 = vld [vmem:[#allocation6 + $0x71] sm:$0xff] }
 0x39f   : > { %v2231_v46 = vadd.f32 %v2223_v47, %v2203_v11  ;;  %v2038_v62 = vmul.f32 %v2185_v18, %v4078_v2  ;;  %v2058_v38 = vmul.f32 %v2213_v27, %v4081_v41  ;;  %v2121_v17 = vadd.f32 %v2113_v23, %v2093_v28 }
 0x3a0   : > { %v2281_v57 = vmax.f32 %v2273_v51, 0.0  ;;  %v2232_v21 = vadd.f32 %v2224_v22, %v2204_v10  ;;  %v2176_v13 = vadd.f32 %v2168_v30, %v2148_v42  ;;  %v2253_v5 = vmul.f32 %v4100_v14, %v2241_v19  ;;  %v2243_v42 = vld [vmem:[#allocation6 + $0x72] sm:$0xff] }
 0x3a1   : > { %v2259_v8 = vadd.f32 %v2251_v16, %v2231_v46  ;;  %v2169_v47 = vmul.f32 %v2241_v19, %v4117_v53  ;;  %v2066_v15 = vadd.f32 %v2058_v38, %v2038_v62  ;;  %v2086_v35 = vmul.f32 %v2241_v19, %v4087_v12 }
 0x3a2   : > { %3278 = vmatprep.mubr.msk.f32.mxu1 %vm1982_vm6, %v2281_v57  ;;  %v2260_v50 = vadd.f32 %v2252_v6, %v2232_v21  ;;  %v2205_v39 = vadd.f32 %v2197_v24, %v2176_v13  ;;  %v2149_v61 = vadd.f32 %v2141_v43, %v2121_v17  ;;  %v2198_v22 = vmul.f32 %v4094_v55, %v2186_v34  ;;  %v2188_v17 = vld [vmem:[#allocation6 + $0x80] sm:$0xff] }
 0x3a3   : > { %v2274_v26 = vadd.f32 %v4154_v63, %v2259_v8  ;;  %v2226_v16 = vmul.f32 %v4104_v33, %v2214_v44  ;;  %v2094_v7 = vadd.f32 %v2086_v35, %v2066_v15  ;;  %v2114_v18 = vmul.f32 %v2186_v34, %v4108_v31  ;;  %v2216_v35 = vld [vmem:[#allocation6 + $0x81] sm:$0xff] }
 0x3a4   : > { %v2275_v40 = vadd.f32 %v4154_v63, %v2260_v50  ;;  %v2233_v58 = vadd.f32 %v2225_v37, %v2205_v39  ;;  %v2177_v4 = vadd.f32 %v2169_v47, %v2149_v61  ;;  %v2142_v27 = vmul.f32 %v2214_v44, %v4113_v1 }
 0x3a5   : > { %v2282_v56 = vmax.f32 %v2274_v26, 0.0  ;;  %v2122_v20 = vadd.f32 %v2114_v18, %v2094_v7  ;;  %v2039_v6 = vmul.f32 %v2186_v34, %v4078_v2  ;;  %v2059_v25 = vmul.f32 %v2214_v44, %v4081_v41  ;;  %v2189_v7 = vld [vmem:[#allocation6 + $0x90] sm:$0xff] }
 0x3a6   : > { %v2283_v49 = vmax.f32 %v2275_v40, 0.0  ;;  %v2261_v0 = vadd.f32 %v2253_v5, %v2233_v58  ;;  %v2206_v36 = vadd.f32 %v2198_v22, %v2177_v4  ;;  %v2170_v23 = vmul.f32 %v2242_v59, %v4117_v53  ;;  %v2217_v4 = vld [vmem:[#allocation6 + $0x91] sm:$0xff] }
 0x3a7   : > { %3279 = vmatmul.mubr.msk.f32.vlgmr.msra.gmra.mxu1 %vm1982_vm6, %v2282_v56  ;;  %v2150_v11 = vadd.f32 %v2142_v27, %v2122_v20  ;;  %v2067_v54 = vadd.f32 %v2059_v25, %v2039_v6  ;;  %v2087_v45 = vmul.f32 %v2242_v59, %v4087_v12  ;;  %v2115_v51 = vmul.f32 %v2187_v29, %v4108_v31 }
 0x3a8   : > { %3281 = vmatprep.mubr.msk.f32.mxu1 %vm1982_vm6, %v2283_v49  ;;  %v2276_v30 = vadd.f32 %v4154_v63, %v2261_v0  ;;  %v2234_v24 = vadd.f32 %v2226_v16, %v2206_v36  ;;  %v2254_v37 = vmul.f32 %v4100_v14, %v2242_v59  ;;  %v2199_v10 = vmul.f32 %v4094_v55, %v2187_v29  ;;  %v2244_v59 = vld [vmem:[#allocation6 + $0x82] sm:$0xff]  ;;  %v2245_v49 = vld [vmem:[#allocation6 + $0x92] sm:$0xff] }
 0x3a9   : > { %v2178_v46 = vadd.f32 %v2170_v23, %v2150_v11  ;;  %v2095_v19 = vadd.f32 %v2087_v45, %v2067_v54  ;;  %v2040_v43 = vmul.f32 %v2187_v29, %v4078_v2  ;;  %v2060_v62 = vmul.f32 %v2215_v3, %v4081_v41 }
 0x3aa   : > { %v2284_v28 = vmax.f32 %v2276_v30, 0.0  ;;  %v2262_v57 = vadd.f32 %v2254_v37, %v2234_v24  ;;  %v2227_v8 = vmul.f32 %v4104_v33, %v2215_v3  ;;  %v2143_v13 = vmul.f32 %v2215_v3, %v4113_v1  ;;  %v2969_v30 = vld [vmem:[%s4350_s14] ss:$0 sm:$0xff] }
 0x3ab   : > { %v2207_v38 = vadd.f32 %v2199_v10, %v2178_v46  ;;  %v2123_v21 = vadd.f32 %v2115_v51, %v2095_v19  ;;  %v2068_v44 = vadd.f32 %v2060_v62, %v2040_v43  ;;  %v2088_v5 = vmul.f32 %v2243_v42, %v4087_v12 }
 0x3ac   : > { %3282 = vmatmul.mubr.msk.f32.gmra.mxu1 %vm1982_vm6, %v2284_v28  ;;  %v2277_v34 = vadd.f32 %v4154_v63, %v2262_v57  ;;  %v2255_v15 = vmul.f32 %v4100_v14, %v2243_v42  ;;  %v2171_v41 = vmul.f32 %v2243_v42, %v4117_v53  ;;  %v2116_v39 = vmul.f32 %v2188_v17, %v4108_v31 }
 0x3ad   : > { %v2235_v47 = vadd.f32 %v2227_v8, %v2207_v38  ;;  %v2151_v2 = vadd.f32 %v2143_v13, %v2123_v21  ;;  %v2096_v50 = vadd.f32 %v2088_v5, %v2068_v44  ;;  %v2200_v16 = vmul.f32 %v4094_v55, %v2188_v17  ;;  %v2625_v17 = vld [vmem:[%s4353_s17 + $0xb0] sm:$0xff]  ;;  %v2626_v44 = vld [vmem:[%s4353_s17 + $0xb8] sm:$0xff] }
 0x3ae   : > { %v2285_v26 = vmax.f32 %v2277_v34, 0.0  ;;  %v2144_v18 = vmul.f32 %v2216_v35, %v4113_v1  ;;  %v2228_v58 = vmul.f32 %v4104_v33, %v2216_v35  ;;  %v2172_v31 = vmul.f32 %v2244_v59, %v4117_v53  ;;  %2663 = vmatprep.subr.mxu1 %v2625_v17  ;;  %v2624_v34 = vld [vmem:[%s4353_s17 + $0xa8] sm:$0xff]  ;;  %v2622_v5 = vld [vmem:[%s4353_s17 + $0x98] sm:$0xff] }
 0x3af   : > { %v2263_v61 = vadd.f32 %v2255_v15, %v2235_v47  ;;  %v2179_v22 = vadd.f32 %v2171_v41, %v2151_v2  ;;  %v2124_v12 = vadd.f32 %v2116_v39, %v2096_v50  ;;  %v2201_v20 = vmul.f32 %v4094_v55, %v2189_v7  ;;  %2664 = vmatpush1.msra.mxu1 %v2624_v34  ;;  %v2621_v47 = vld [vmem:[%s4353_s17 + $0x90] sm:$0xff]  ;;  %v2623_v15 = vld [vmem:[%s4353_s17 + $0xa0] sm:$0xff]  ;;  %v2618_v41 = vld [vmem:[%s4353_s17 + $0x78] sm:$0xff] }
 0x3b0   : > { %3284 = vmatprep.mubr.msk.f32.mxu1 %vm1982_vm6, %v2285_v26  ;;  %v2256_v25 = vmul.f32 %v4100_v14, %v2244_v59  ;;  %v2229_v36 = vmul.f32 %v4104_v33, %v2217_v4  ;;  %v2257_v11 = vmul.f32 %v4100_v14, %v2245_v49  ;;  %v2431_v33 = vld [vmem:[%s4351_s15] sm:$0xff]  ;;  %2665 = vmatprep.subr.mxu1 %v2622_v5  ;;  %v2620_v35 = vld [vmem:[%s4353_s17 + $0x88] sm:$0xff]  ;;  %v2617_v39 = vld [vmem:[%s4353_s17 + $0x70] sm:$0xff] }
 0x3b1   : > { %v2278_v56 = vadd.f32 %v4154_v63, %v2263_v61  ;;  %v2208_v40 = vadd.f32 %v2200_v16, %v2179_v22  ;;  %v2152_v29 = vadd.f32 %v2144_v18, %v2124_v12  ;;  %3296 = vmatprep.subr.mxu0 %v2431_v33  ;;  %2666 = vmatpush1.msra.mxu1 %v2621_v47  ;;  %v2619_v2 = vld [vmem:[%s4353_s17 + $0x80] sm:$0xff]  ;;  %v2616_v26 = vld [vmem:[%s4353_s17 + $0x68] sm:$0xff]  ;;  %v2613_v61 = vld [vmem:[%s4353_s17 + $0x50] sm:$0xff] }
 0x3b2   : > { %3297 = vmatpush3.msra.mxu0 %v2431_v33  ;;  %2667 = vmatprep.subr.mxu1 %v2619_v2  ;;  %v2615_v50 = vld [vmem:[%s4353_s17 + $0x60] sm:$0xff]  ;;  %v2612_v22 = vld [vmem:[%s4353_s17 + $0x48] sm:$0xff]  ;;  %v2614_v16 = vld [vmem:[%s4353_s17 + $0x58] sm:$0xff] }
 0x3b3   : > { %v2286_v27 = vmax.f32 %v2278_v56, 0.0  ;;  %v2236_v6 = vadd.f32 %v2228_v58, %v2208_v40  ;;  %v2180_v0 = vadd.f32 %v2172_v31, %v2152_v29  ;;  %3310 = vmatprep.subr.mxu0 %v4386_v60  ;;  %2668 = vmatpush1.msra.mxu1 %v2618_v41  ;;  %v2610_v59 = vld [vmem:[%s4353_s17 + $0x38] sm:$0xff]  ;;  %v2609_v7 = vld [vmem:[%s4353_s17 + $0x30] sm:$0xff]  ;;  %v2607_v12 = vld [vmem:[%s4353_s17 + $0x20] sm:$0xff] }
 0x3b4   : > { %2669 = vmatprep.subr.mxu1 %v2616_v26  ;;  %v2611_v18 = vld [vmem:[%s4353_s17 + $0x40] sm:$0xff]  ;;  %v2606_v56 = vld [vmem:[%s4353_s17 + $0x18] sm:$0xff]  ;;  %v2604_v40 = vld [vmem:[%s4353_s17 + $0x8] sm:$0xff] }
 0x3b5   : > { %3285 = vmatmul.mubr.msk.f32.gmra.mxu1 %vm1982_vm6, %v2286_v27  ;;  %v2264_v1 = vadd.f32 %v2256_v25, %v2236_v6  ;;  %v2209_v23 = vadd.f32 %v2201_v20, %v2180_v0  ;;  %v2608_v58 = vld [vmem:[%s4353_s17 + $0x28] sm:$0xff]  ;;  %v2603_v4 = vld [vmem:[%s4353_s17] sm:$0xff]  ;;  %v2605_v29 = vld [vmem:[%s4353_s17 + $0x10] sm:$0xff] }
 0x3b6   : > { %2670 = vmatpush1.msra.mxu1 %v2615_v50  ;;  %v2978_v27 = vld [vmem:[%s4352_s16] ss:$0 sm:$0xff] }
 0x3b7   : > { %v2279_v3 = vadd.f32 %v4154_v63, %v2264_v1  ;;  %v2237_v54 = vadd.f32 %v2229_v36, %v2209_v23  ;;  %2671 = vmatprep.subr.mxu1 %v2613_v61 }
 0x3b8   : > { %2672 = vmatpush1.msra.mxu1 %v2612_v22  ;;  %v2627_v22 = vld [vmem:[%s4354_s18] sm:$0x7] }
 0x3b9   : > { %v2287_v53 = vmax.f32 %v2279_v3, 0.0  ;;  %v2265_v45 = vadd.f32 %v2257_v11, %v2237_v54  ;;  %2673 = vmatprep.subr.mxu1 %v2610_v59  ;;  %v2640_v59 = vrot.slane %v2627_v22, %v4389_v9 }
 0x3ba   : > { %2674 = vmatpush1.msra.mxu1 %v2609_v7 }
 0x3bb   : > { %3287 = vmatprep.mubr.msk.f32.mxu1 %vm1982_vm6, %v2287_v53  ;;  %v2280_v55 = vadd.f32 %v4154_v63, %v2265_v45  ;;  %2675 = vmatprep.subr.mxu1 %v2607_v12  ;;  %v2636_v12 = vrot.slane %v2627_v22, %v4388_v52 }
 0x3bc   : > { %2676 = vmatpush1.msra.mxu1 %v2606_v56 }
 0x3bd   : > { %v2288_v51 = vmax.f32 %v2280_v55, 0.0  ;;  %2677 = vmatprep.subr.mxu1 %v2604_v40 }
 0x3be   : > { %2678 = vmatpush1.msra.mxu1 %v2603_v4 }
 0x3bf   : > { %3288 = vmatmul.mubr.msk.f32.gmra.mxu1 %vm1982_vm6, %v2288_v51 }
 0x3c0   : > { %2711 = vmatprep.mubr.f32.mxu1 %v4386_v60 }
 0x467   : > { %v3280_v14 = vpop.f32.mrf.mxu1 }
 0x468   : > { %v2398_v37 = vadd.f32 %v3280_v14, %v2969_v30 }
 0x469   : > { %v2392_v24 = vpop.f32.mrf.mxu1 }
 0x46a   : > { %v2393_v63 = vadd.f32 %v2969_v30, %v2392_v24 }
 0x46c   : > { %3298 = vmatprep.mubr.msk.f32.mxu0 %vm1366_vm3, %v2393_v63  ;;  %v3283_v46 = vpop.f32.mrf.mxu1 }
 0x46d   : > { %3299 = vmatmul.mubr.msk.f32.vlgmr.msra.gmra.mxu0 %vm1366_vm3, %v2398_v37  ;;  %v2408_v19 = vadd.f32 %v3283_v46, %v2969_v30 }
 0x46e   : > { %v2402_v10 = vpop.f32.mrf.mxu1  ;;  %3311 = vmatpush3.msra.mxu0 %v2626_v44 }
 0x46f   : > { %v2403_v42 = vadd.f32 %v2969_v30, %v2402_v10  ;;  %3312 = vmatprep.subr.mxu0 %v4386_v60 }
 0x470   : > { %3313 = vmatpush3.msra.mxu0 %v2623_v15 }
 0x471   : > { %3301 = vmatprep.mubr.msk.f32.mxu0 %vm1366_vm3, %v2403_v42  ;;  %3314 = vmatprep.subr.mxu0 %v4386_v60 }
 0x472   : > { %3302 = vmatmul.mubr.msk.f32.gmra.mxu0 %vm1366_vm3, %v2408_v19 }
 0x473   : > { %3315 = vmatpush3.msra.mxu0 %v2620_v35 }
 0x474   : > { %3316 = vmatprep.subr.mxu0 %v4386_v60 }
 0x475   : > { %v3286_v28 = vpop.f32.mrf.mxu1  ;;  %3317 = vmatpush3.msra.mxu0 %v2617_v39  ;;  %v3351_v39 = vmov 1966171168  }
 0x476   : > { %v2418_v62 = vadd.f32 %v3286_v28, %v2969_v30  ;;  %3318 = vmatprep.subr.mxu0 %v4386_v60  ;;  %v2793_v61 = vunpack.c.l.s4 %v3351_v39 }
 0x477   : > { %v2412_v57 = vpop.f32.mrf.mxu1  ;;  %3319 = vmatpush3.msra.mxu0 %v2614_v16  ;;  %v2632_v16 = vrot.slane %v2627_v22, %v4387_v32  ;;  %v4396_v32 = vlaneseq }
 0x478   : > { %v2413_v43 = vadd.f32 %v2969_v30, %v2412_v57  ;;  %3320 = vmatprep.subr.mxu0 %v4386_v60  ;;  %v2794_v7 = vunpack.c.0.s8 %v2793_v61 }
 0x479   : > { %3321 = vmatpush3.msra.mxu0 %v2611_v18  ;;  %vm2817_vm11 = vcmp.lt.s32.totalorder %v4396_v32, 384 }
 0x47a   : > { %3304 = vmatprep.mubr.msk.f32.mxu0 %vm1366_vm3, %v2413_v43  ;;  %3322 = vmatprep.subr.mxu0 %v4386_v60 }
 0x47b   : > { %3305 = vmatmul.mubr.msk.f32.gmra.mxu0 %vm1366_vm3, %v2418_v62 }
 0x47c   : > { %3323 = vmatpush3.msra.mxu0 %v2608_v58 }
 0x47d   : > { %3324 = vmatprep.subr.mxu0 %v4386_v60 }
 0x47e   : > { %3325 = vmatpush3.msra.mxu0 %v2605_v29 }
 0x47f   : > { %v3289_v38 = vpop.f32.mrf.mxu1 }
 0x480   : > { %v2428_v13 = vadd.f32 %v3289_v38, %v2969_v30 }
 0x481   : > { %v2422_v8 = vpop.f32.mrf.mxu1 }
 0x482   : > { %v2423_v21 = vadd.f32 %v2969_v30, %v2422_v8 }
 0x484   : > { %3307 = vmatprep.mubr.msk.f32.mxu0 %vm1366_vm3, %v2423_v21 }
 0x485   : > { %3308 = vmatmul.mubr.msk.f32.gmra.mxu0 %vm1366_vm3, %v2428_v13 }
 0x486   : > { %3326 = vmatprep.mubr.msk.f32.mxu0 %vm3350_vm9, %v4386_v60 }
 0x52d   : > { %v3300_v31 = vpop.f32.mrf.mxu0 }
 0x52e   : > { %v2538_v49 = vadd.f32 %v3300_v31, %v2978_v27  ;;  %v2797_v31 = vsub.s32 %v2794_v7, %v4390_v48 }
 0x52f   : > { %v2532_v20 = vpop.f32.mrf.mxu0 }
 0x530   : > { %v2533_v6 = vadd.f32 %v2978_v27, %v2532_v20  ;;  %v2572_v23 = vmax.f32 %v2538_v49, 0.0 }
 0x532   : > { %v3303_v25 = vpop.f32.mrf.mxu0  ;;  %v2571_v36 = vmax.f32 %v2533_v6, 0.0  ;;  %v2581_v60 = vsel %vm2579_vm10, %v2572_v23, 0.0 }
 0x533   : > { %v2548_v54 = vadd.f32 %v3303_v25, %v2978_v27 }
 0x534   : > { %v2542_v0 = vpop.f32.mrf.mxu0  ;;  %v2580_v3 = vsel %vm2579_vm10, %v2571_v36, 0.0 }
 0x535   : > { %v2543_v1 = vadd.f32 %v2978_v27, %v2542_v0  ;;  %v2582_v55 = vadd.f32 %v2581_v60, %v2580_v3  ;;  %v2574_v51 = vmax.f32 %v2548_v54, 0.0 }
 0x537   : > { %v2573_v11 = vmax.f32 %v2543_v1, 0.0  ;;  %v2585_v63 = vsel %vm2579_vm10, %v2574_v51, 0.0 }
 0x539   : > { %v2583_v53 = vsel %vm2579_vm10, %v2573_v11, 0.0 }
 0x53a   : > { %v2584_v14 = vadd.f32 %v2583_v53, %v2582_v55 }
 0x53b   : > { %v3306_v45 = vpop.f32.mrf.mxu0 }
 0x53c   : > { %v2558_v37 = vadd.f32 %v3306_v45, %v2978_v27  ;;  %v2586_v46 = vadd.f32 %v2585_v63, %v2584_v14 }
 0x53d   : > { %v2552_v33 = vpop.f32.mrf.mxu0 }
 0x53e   : > { %v2553_v30 = vadd.f32 %v2978_v27, %v2552_v33  ;;  %v2576_v42 = vmax.f32 %v2558_v37, 0.0 }
 0x540   : > { %v2575_v24 = vmax.f32 %v2553_v30, 0.0  ;;  %v2589_v62 = vsel %vm2579_vm10, %v2576_v42, 0.0 }
 0x542   : > { %v2587_v10 = vsel %vm2579_vm10, %v2575_v24, 0.0 }
 0x543   : > { %v2588_v19 = vadd.f32 %v2587_v10, %v2586_v46 }
 0x545   : > { %v3309_v28 = vpop.f32.mrf.mxu0  ;;  %v2590_v8 = vadd.f32 %v2589_v62, %v2588_v19 }
 0x546   : > { %v2568_v57 = vadd.f32 %v3309_v28, %v2978_v27 }
 0x547   : > { %v2562_v43 = vpop.f32.mrf.mxu0 }
 0x548   : > { %v2563_v38 = vadd.f32 %v2978_v27, %v2562_v43  ;;  %v2578_v21 = vmax.f32 %v2568_v57, 0.0 }
 0x54a   : > { %v2577_v13 = vmax.f32 %v2563_v38, 0.0  ;;  %v2593_v44 = vsel %vm2579_vm10, %v2578_v21, 0.0 }
 0x54c   : > { %v2591_v17 = vsel %vm2579_vm10, %v2577_v13, 0.0 }
 0x54d   : > { %v2592_v34 = vadd.f32 %v2591_v17, %v2590_v8 }
 0x54f   : > { %v2594_v5 = vadd.f32 %v2593_v44, %v2592_v34 }
 0x551   : > { %v2595_v47 = vrot.slane %v2594_v5, 4 }
 0x553   : > { %v2596_v15 = vadd.f32 %v2595_v47, %v2594_v5 }
 0x555   : > { %v2597_v2 = vrot.slane %v2596_v15, 2 }
 0x557   : > { %v2598_v41 = vadd.f32 %v2597_v2, %v2596_v15 }
 0x559   : > { %v2599_v35 = vrot.slane %v2598_v41, 1 }
 0x55b   : > { %v2600_v26 = vadd.f32 %v2599_v35, %v2598_v41 }
 0x55d   : > { %v2602_v50 = vmul.f32 0.015625, %v2600_v26 }
 0x55f   : > { %2987 = vmatmul.mubr.msk.f32.vlgmr.msra.gmra.mxu1 %vm2579_vm10, %v2602_v50  ;;  %3327 = vmatmul.mubr.msk.f32.vlgmr.msra.gmra.mxu0 %vm2579_vm10, %v2602_v50 }
 0x61f   : > { %v2713_v18 = vpop.f32.mrf.mxu1  ;;  %v2784_v56 = vpop.f32.mrf.mxu0 }
 0x620   : > { %v2714_v4 = vadd.f32 %v2713_v18, %v2632_v16  ;;  %v2785_v29 = vadd.f32 %v2784_v56, %v2640_v59 }
 0x621   : > { %v2715_v40 = vpop.f32.mrf.mxu1  ;;  %v3328_v58 = vpop.f32.mrf.mxu0 }
 0x622   : > { %v2716_v20 = vadd.f32 %v2715_v40, %v2636_v12  ;;  %v2805_v6 = vrot.slane %v2785_v29, %v2797_v31 }
 0x624   : > { %v2791_v27 = vcombine.low %v2714_v4, %v2716_v20 }
 0x626   : > { %v2798_v25 = vrot.slane %v2791_v27, %v2797_v31 }
 0x628   : > { %v2806_v49 = vcombine.low %v2798_v25, %v2805_v6 }
 0x62a   : > { %v2813_v52 = vrot.slane %v2806_v49, %v2797_v31 }
 0x62c   : > { %2819 = vst.msk [vmem:[%s600_s26] sm:$0x7] %vm2817_vm11, %v2813_v52 }
 0x62d PF: > { %s29_s0 = sadd.s32 1, %s3347_s0  }
 0x62e   : > { %p26_p4 = scmp.ge.s32.totalorder %s29_s0, 4  }
 0x630   :  { %28 = sbr.rel (!%p26_p4) target bundleno = 5 (0x5), region = 133 }

</bundles_post_ra>
